<compile_context>
chip_gen: v6e
topology: v6e:2x2x1
jax: 0.10.0
libtpu: 0.0.40
codegen_flags: <defaults>
</compile_context>

<pallas_src>
import functools

import numpy as np
import jax
import jax.numpy as jnp
from jax.experimental import pallas as pl
from jax.experimental.pallas import tpu as pltpu


def _softplus(x):
    # Numerically stable softplus matching torch.nn.Softplus (beta=1) to fp32
    # precision, written with exp/log only (guaranteed Mosaic lowerings).
    return jnp.maximum(x, 0.0) + jnp.log(1.0 + jnp.exp(-jnp.abs(x)))


def _dff_kernel(sigma_ref, x_ref,
                w1_ref, b1_ref, w2_ref, b2_ref, w3_ref, b3_ref, w4_ref, b4_ref,
                wr_ref, br_ref, o_ref, *, d_out, variant):
    # ---- latent MLP: 3x (Linear + Softplus) then Linear -> d_latent ----
    h = x_ref[...].astype(jnp.float32)
    h = _softplus(jnp.dot(h, w1_ref[...], preferred_element_type=jnp.float32)
                  + b1_ref[...])
    h = _softplus(jnp.dot(h, w2_ref[...], preferred_element_type=jnp.float32)
                  + b2_ref[...])
    h = _softplus(jnp.dot(h, w3_ref[...], preferred_element_type=jnp.float32)
                  + b3_ref[...])
    z = jnp.dot(h, w4_ref[...], preferred_element_type=jnp.float32) + b4_ref[...]

    # ---- RFF_tuneable head ----
    sigma = sigma_ref[0]  # scalar from SMEM (free scalar-slot read)
    if variant == "cosine_sine":
        # w_times_x = z @ ((1/sigma) * W); scalar scale fused after the matmul.
        wx = jnp.dot(z, wr_ref[...],
                     preferred_element_type=jnp.float32) * (1.0 / sigma)
        scale = float(np.sqrt(1.0 / d_out))
        # Matches torch.cat((cos, sin), dim=-1).  Both half-stores are
        # lane-aligned (unmasked vst) whenever d_out % 128 == 0.
        # For very large / non-128-multiple d_out, a second grid axis over
        # d_out with separate cos/sin outputs would keep stores lane-dense.
        o_ref[:, 0:d_out] = (scale * jnp.cos(wx)).astype(o_ref.dtype)
        o_ref[:, d_out:2 * d_out] = (scale * jnp.sin(wx)).astype(o_ref.dtype)
    else:  # 'cosine'
        # Exact 1/sqrt(sigma) (VPU sqrt + divide), not the approximate rsqrt.
        wx = (jnp.dot(z, wr_ref[...], preferred_element_type=jnp.float32)
              * (1.0 / jnp.sqrt(sigma)) + br_ref[...])
        scale = float(np.sqrt(2.0 / d_out))
        o_ref[...] = (scale * jnp.cos(wx)).astype(o_ref.dtype)


def _choose_row_tile(n_rows, d_in, out_width):
    """Pick the batch-row tile size.

    Small problems collapse to a single pipeline step (weights loaded once,
    no per-step overhead).  Large problems get the biggest multiple-of-8 tile
    whose double-buffered f32 in/out blocks fit a ~24 MiB budget, which is
    safe on v7x (64 MiB physical VMEM / 2 TCs) as well as v5e/v6e.
    """
    if n_rows <= 512:
        return n_rows
    budget_bytes = 24 * 1024 * 1024
    bytes_per_row = 2 * (d_in + out_width) * 4  # double-buffered f32 in + out
    tm = budget_bytes // max(bytes_per_row, 1)
    tm = int(min(tm, 2048, n_rows))
    tm = max(8, (tm // 8) * 8)
    return tm


def deep_fourier_features_forward(x, latent_params, rff_weight, rff_bias, sigma,
                                  variant="cosine_sine", tm=None,
                                  out_dtype=jnp.float32):
    """Fused forward pass of DeepFourierFeaturesSingleKernel.

    latent_params: list of four (W, b) pairs, W shaped (in_features, out_features)
                   (i.e. torch Linear weight transposed).
    rff_weight:    (d_latent, d_out);  rff_bias: (d_out,);  sigma: scalar.
    """
    if variant not in ("cosine_sine", "cosine"):
        raise ValueError("False variant, choose between cosine or cosine_sine")

    N, d_in = x.shape
    (w1, b1), (w2, b2), (w3, b3), (w4, b4) = latent_params
    H = w1.shape[1]
    d_latent = w4.shape[1]
    d_out = rff_weight.shape[1]
    out_width = 2 * d_out if variant == "cosine_sine" else d_out

    if tm is None:
        tm = _choose_row_tile(N, d_in, out_width)
    tm = int(min(tm, N))
    grid = (pl.cdiv(N, tm),)

    f32 = jnp.float32
    sigma1d = jnp.reshape(sigma, (1,)).astype(f32)
    xs = x.astype(f32)
    w1f, w2f, w3f, w4f = (w.astype(f32) for w in (w1, w2, w3, w4))
    b1r = jnp.reshape(b1, (1, H)).astype(f32)
    b2r = jnp.reshape(b2, (1, H)).astype(f32)
    b3r = jnp.reshape(b3, (1, H)).astype(f32)
    b4r = jnp.reshape(b4, (1, d_latent)).astype(f32)
    wr = rff_weight.astype(f32)
    br = jnp.reshape(rff_bias, (1, d_out)).astype(f32)

    def full2d(shape):
        return pl.BlockSpec(shape, lambda i: (0, 0))

    in_specs = [
        pl.BlockSpec(memory_space=pltpu.MemorySpace.SMEM),   # sigma (SMEM scalar)
        pl.BlockSpec((tm, d_in), lambda i: (i, 0)),          # x row tile
        full2d((d_in, H)), full2d((1, H)),                   # layer 1
        full2d((H, H)), full2d((1, H)),                      # layer 2
        full2d((H, H)), full2d((1, H)),                      # layer 3
        full2d((H, d_latent)), full2d((1, d_latent)),        # layer 4
        full2d((d_latent, d_out)), full2d((1, d_out)),       # RFF weight / bias
    ]
    out_spec = pl.BlockSpec((tm, out_width), lambda i: (i, 0))

    # Advisory cost estimate for the XLA scheduler.
    flops = 2 * N * (d_in * H + 2 * H * H + H * d_latent + d_latent * d_out)
    transcendentals = N * (6 * H + (2 if variant == "cosine_sine" else 1) * d_out)
    weight_bytes = 4 * (d_in * H + H + 2 * (H * H + H) + H * d_latent + d_latent
                        + d_latent * d_out + d_out)
    bytes_accessed = 4 * N * d_in + weight_bytes + \
        int(np.dtype(out_dtype).itemsize) * N * out_width
    cost = pl.CostEstimate(flops=int(flops),
                           transcendentals=int(transcendentals),
                           bytes_accessed=int(bytes_accessed))

    kernel = functools.partial(_dff_kernel, d_out=d_out, variant=variant)
    return pl.pallas_call(
        kernel,
        out_shape=jax.ShapeDtypeStruct((N, out_width), out_dtype),
        grid=grid,
        in_specs=in_specs,
        out_specs=out_spec,
        compiler_params=pltpu.CompilerParams(
            dimension_semantics=("parallel",),
            # v5e's scoped default is only 16 MiB; raise it so large row tiles
            # compile there too.  Actual usage is kept well under ~24 MiB.
            vmem_limit_bytes=64 * 1024 * 1024,
        ),
        cost_estimate=cost,
    )(sigma1d, xs, w1f, b1r, w2f, b2r, w3f, b3r, w4f, b4r, wr, br)


if __name__ == "__main__":
    # Small deterministic shapes consistent with the module:
    # d_in=8, H=32, d_latent=16, n_RFF=128, batch N=64.
    N, d_in, H, d_latent, n_RFF = 64, 8, 32, 16, 128

    key = jax.random.PRNGKey(0)
    keys = jax.random.split(key, 11)

    def make_linear(kw, kb, fan_in, fan_out):
        # torch.nn.Linear default init: U(-1/sqrt(fan_in), 1/sqrt(fan_in)),
        # stored here as (in, out) == torch W.T.
        lim = 1.0 / np.sqrt(fan_in)
        w = jax.random.uniform(kw, (fan_in, fan_out), jnp.float32, -lim, lim)
        b = jax.random.uniform(kb, (fan_out,), jnp.float32, -lim, lim)
        return w, b

    latent_params = [
        make_linear(keys[0], keys[1], d_in, H),
        make_linear(keys[2], keys[3], H, H),
        make_linear(keys[4], keys[5], H, H),
        make_linear(keys[6], keys[7], H, d_latent),
    ]
    rff_weight = jax.random.normal(keys[8], (d_latent, n_RFF), dtype=jnp.float32)
    rff_bias = 2.0 * np.pi * jax.random.uniform(keys[9], (n_RFF,), dtype=jnp.float32)
    sigma = jnp.array(1.5, dtype=jnp.float32)
    x = jax.random.normal(keys[10], (N, d_in), dtype=jnp.float32)

    def reference(x, variant):
        h = x
        for (w, b) in latent_params[:3]:
            h = jax.nn.softplus(h @ w + b)
        z = h @ latent_params[3][0] + latent_params[3][1]
        if variant == "cosine_sine":
            wx = z @ ((1.0 / sigma) * rff_weight)
            return np.sqrt(1.0 / n_RFF) * jnp.concatenate(
                [jnp.cos(wx), jnp.sin(wx)], axis=-1)
        wx = z @ ((1.0 / jnp.sqrt(sigma)) * rff_weight) + rff_bias
        return np.sqrt(2.0 / n_RFF) * jnp.cos(wx)

    # Default variant: 'cosine_sine'
    out_cs = deep_fourier_features_forward(x, latent_params, rff_weight, rff_bias,
                                           sigma, variant="cosine_sine")
    jax.block_until_ready(out_cs)
    np.testing.assert_allclose(np.asarray(out_cs),
                               np.asarray(reference(x, "cosine_sine")),
                               rtol=1e-4, atol=1e-5)

    # Also exercise the 'cosine' variant (uses the RFF bias).
    out_c = deep_fourier_features_forward(x, latent_params, rff_weight, rff_bias,
                                          sigma, variant="cosine")
    jax.block_until_ready(out_c)
    np.testing.assert_allclose(np.asarray(out_c),
                               np.asarray(reference(x, "cosine")),
                               rtol=1e-4, atol=1e-5)

    print("KERNEL_OK")
</pallas_src>

<mosaic_0001>
module attributes {stable_mosaic.version = 11 : i64} {
  func.func @_dff_kernel(%arg0: i32, %arg1: memref<1xf32, #tpu.memory_space<smem>>, %arg2: memref<64x8xf32, #tpu.memory_space<vmem>>, %arg3: memref<8x32xf32, #tpu.memory_space<vmem>>, %arg4: memref<1x32xf32, #tpu.memory_space<vmem>>, %arg5: memref<32x32xf32, #tpu.memory_space<vmem>>, %arg6: memref<1x32xf32, #tpu.memory_space<vmem>>, %arg7: memref<32x32xf32, #tpu.memory_space<vmem>>, %arg8: memref<1x32xf32, #tpu.memory_space<vmem>>, %arg9: memref<32x16xf32, #tpu.memory_space<vmem>>, %arg10: memref<1x16xf32, #tpu.memory_space<vmem>>, %arg11: memref<16x128xf32, #tpu.memory_space<vmem>>, %arg12: memref<1x128xf32, #tpu.memory_space<vmem>>, %arg13: memref<64x256xf32, #tpu.memory_space<vmem>>) attributes {dimension_semantics = [#tpu.dimension_semantics<parallel>], iteration_bounds = array<i64: 1>, scalar_prefetch = 0 : i64, scratch_operands = 0 : i64, tpu.core_type = #tpu.core_type<tc>, window_params = [{transform_indices = @transform_0, window_bounds = array<i64: 1>}, {transform_indices = @transform_1, window_bounds = array<i64: 64, 8>}, {pipeline_mode = #tpu.pipeline_mode<synchronous>, transform_indices = @transform_2, window_bounds = array<i64: 8, 32>}, {pipeline_mode = #tpu.pipeline_mode<synchronous>, transform_indices = @transform_3, window_bounds = array<i64: 1, 32>}, {pipeline_mode = #tpu.pipeline_mode<synchronous>, transform_indices = @transform_4, window_bounds = array<i64: 32, 32>}, {pipeline_mode = #tpu.pipeline_mode<synchronous>, transform_indices = @transform_5, window_bounds = array<i64: 1, 32>}, {pipeline_mode = #tpu.pipeline_mode<synchronous>, transform_indices = @transform_6, window_bounds = array<i64: 32, 32>}, {pipeline_mode = #tpu.pipeline_mode<synchronous>, transform_indices = @transform_7, window_bounds = array<i64: 1, 32>}, {pipeline_mode = #tpu.pipeline_mode<synchronous>, transform_indices = @transform_8, window_bounds = array<i64: 32, 16>}, {pipeline_mode = #tpu.pipeline_mode<synchronous>, transform_indices = @transform_9, window_bounds = array<i64: 1, 16>}, {pipeline_mode = #tpu.pipeline_mode<synchronous>, transform_indices = @transform_10, window_bounds = array<i64: 16, 128>}, {pipeline_mode = #tpu.pipeline_mode<synchronous>, transform_indices = @transform_11, window_bounds = array<i64: 1, 128>}, {transform_indices = @transform_12, window_bounds = array<i64: 64, 256>}]} {
    %c0 = arith.constant 0 : index
    %c0_0 = arith.constant 0 : index
    %0 = vector.load %arg2[%c0, %c0_0] : memref<64x8xf32, #tpu.memory_space<vmem>>, vector<64x8xf32>
    %c0_1 = arith.constant 0 : index
    %c0_2 = arith.constant 0 : index
    %1 = vector.load %arg3[%c0_1, %c0_2] : memref<8x32xf32, #tpu.memory_space<vmem>>, vector<8x32xf32>
    %cst = arith.constant dense<0.000000e+00> : vector<64x32xf32>
    %2 = tpu.matmul %0, %1, %cst {dimension_numbers = #tpu.dot_dimension_numbers<[1], [0], [0], [1], [0, 0, 1, 1], [], []>} : vector<64x8xf32>, vector<8x32xf32>, vector<64x32xf32> -> vector<64x32xf32>
    %c0_3 = arith.constant 0 : index
    %c0_4 = arith.constant 0 : index
    %3 = vector.load %arg4[%c0_3, %c0_4] : memref<1x32xf32, #tpu.memory_space<vmem>>, vector<1x32xf32>
    %4 = vector.broadcast %3 : vector<1x32xf32> to vector<64x32xf32>
    %5 = arith.addf %2, %4 : vector<64x32xf32>
    %cst_5 = arith.constant 0.000000e+00 : f32
    %6 = vector.broadcast %cst_5 : f32 to vector<64x32xf32>
    %7 = arith.maximumf %5, %6 : vector<64x32xf32>
    %8 = math.absf %5 : vector<64x32xf32>
    %cst_6 = arith.constant 0.000000e+00 : f32
    %9 = vector.broadcast %cst_6 : f32 to vector<64x32xf32>
    %10 = arith.subf %9, %8 : vector<64x32xf32>
    %11 = math.exp %10 : vector<64x32xf32>
    %cst_7 = arith.constant 1.000000e+00 : f32
    %12 = vector.broadcast %cst_7 : f32 to vector<64x32xf32>
    %13 = arith.addf %12, %11 : vector<64x32xf32>
    %14 = math.log %13 : vector<64x32xf32>
    %15 = arith.addf %7, %14 : vector<64x32xf32>
    %c0_8 = arith.constant 0 : index
    %c0_9 = arith.constant 0 : index
    %16 = vector.load %arg5[%c0_8, %c0_9] : memref<32x32xf32, #tpu.memory_space<vmem>>, vector<32x32xf32>
    %cst_10 = arith.constant dense<0.000000e+00> : vector<64x32xf32>
    %17 = tpu.matmul %15, %16, %cst_10 {dimension_numbers = #tpu.dot_dimension_numbers<[1], [0], [0], [1], [0, 0, 1, 1], [], []>} : vector<64x32xf32>, vector<32x32xf32>, vector<64x32xf32> -> vector<64x32xf32>
    %c0_11 = arith.constant 0 : index
    %c0_12 = arith.constant 0 : index
    %18 = vector.load %arg6[%c0_11, %c0_12] : memref<1x32xf32, #tpu.memory_space<vmem>>, vector<1x32xf32>
    %19 = vector.broadcast %18 : vector<1x32xf32> to vector<64x32xf32>
    %20 = arith.addf %17, %19 : vector<64x32xf32>
    %cst_13 = arith.constant 0.000000e+00 : f32
    %21 = vector.broadcast %cst_13 : f32 to vector<64x32xf32>
    %22 = arith.maximumf %20, %21 : vector<64x32xf32>
    %23 = math.absf %20 : vector<64x32xf32>
    %cst_14 = arith.constant 0.000000e+00 : f32
    %24 = vector.broadcast %cst_14 : f32 to vector<64x32xf32>
    %25 = arith.subf %24, %23 : vector<64x32xf32>
    %26 = math.exp %25 : vector<64x32xf32>
    %cst_15 = arith.constant 1.000000e+00 : f32
    %27 = vector.broadcast %cst_15 : f32 to vector<64x32xf32>
    %28 = arith.addf %27, %26 : vector<64x32xf32>
    %29 = math.log %28 : vector<64x32xf32>
    %30 = arith.addf %22, %29 : vector<64x32xf32>
    %c0_16 = arith.constant 0 : index
    %c0_17 = arith.constant 0 : index
    %31 = vector.load %arg7[%c0_16, %c0_17] : memref<32x32xf32, #tpu.memory_space<vmem>>, vector<32x32xf32>
    %cst_18 = arith.constant dense<0.000000e+00> : vector<64x32xf32>
    %32 = tpu.matmul %30, %31, %cst_18 {dimension_numbers = #tpu.dot_dimension_numbers<[1], [0], [0], [1], [0, 0, 1, 1], [], []>} : vector<64x32xf32>, vector<32x32xf32>, vector<64x32xf32> -> vector<64x32xf32>
    %c0_19 = arith.constant 0 : index
    %c0_20 = arith.constant 0 : index
    %33 = vector.load %arg8[%c0_19, %c0_20] : memref<1x32xf32, #tpu.memory_space<vmem>>, vector<1x32xf32>
    %34 = vector.broadcast %33 : vector<1x32xf32> to vector<64x32xf32>
    %35 = arith.addf %32, %34 : vector<64x32xf32>
    %cst_21 = arith.constant 0.000000e+00 : f32
    %36 = vector.broadcast %cst_21 : f32 to vector<64x32xf32>
    %37 = arith.maximumf %35, %36 : vector<64x32xf32>
    %38 = math.absf %35 : vector<64x32xf32>
    %cst_22 = arith.constant 0.000000e+00 : f32
    %39 = vector.broadcast %cst_22 : f32 to vector<64x32xf32>
    %40 = arith.subf %39, %38 : vector<64x32xf32>
    %41 = math.exp %40 : vector<64x32xf32>
    %cst_23 = arith.constant 1.000000e+00 : f32
    %42 = vector.broadcast %cst_23 : f32 to vector<64x32xf32>
    %43 = arith.addf %42, %41 : vector<64x32xf32>
    %44 = math.log %43 : vector<64x32xf32>
    %45 = arith.addf %37, %44 : vector<64x32xf32>
    %c0_24 = arith.constant 0 : index
    %c0_25 = arith.constant 0 : index
    %46 = vector.load %arg9[%c0_24, %c0_25] : memref<32x16xf32, #tpu.memory_space<vmem>>, vector<32x16xf32>
    %cst_26 = arith.constant dense<0.000000e+00> : vector<64x16xf32>
    %47 = tpu.matmul %45, %46, %cst_26 {dimension_numbers = #tpu.dot_dimension_numbers<[1], [0], [0], [1], [0, 0, 1, 1], [], []>} : vector<64x32xf32>, vector<32x16xf32>, vector<64x16xf32> -> vector<64x16xf32>
    %c0_27 = arith.constant 0 : index
    %c0_28 = arith.constant 0 : index
    %48 = vector.load %arg10[%c0_27, %c0_28] : memref<1x16xf32, #tpu.memory_space<vmem>>, vector<1x16xf32>
    %49 = vector.broadcast %48 : vector<1x16xf32> to vector<64x16xf32>
    %50 = arith.addf %47, %49 : vector<64x16xf32>
    %c0_29 = arith.constant 0 : index
    %51 = memref.load %arg1[%c0_29] : memref<1xf32, #tpu.memory_space<smem>>
    %c0_30 = arith.constant 0 : index
    %c0_31 = arith.constant 0 : index
    %52 = vector.load %arg11[%c0_30, %c0_31] : memref<16x128xf32, #tpu.memory_space<vmem>>, vector<16x128xf32>
    %cst_32 = arith.constant dense<0.000000e+00> : vector<64x128xf32>
    %53 = tpu.matmul %50, %52, %cst_32 {dimension_numbers = #tpu.dot_dimension_numbers<[1], [0], [0], [1], [0, 0, 1, 1], [], []>} : vector<64x16xf32>, vector<16x128xf32>, vector<64x128xf32> -> vector<64x128xf32>
    %cst_33 = arith.constant 1.000000e+00 : f32
    %54 = arith.divf %cst_33, %51 : f32
    %55 = vector.broadcast %54 : f32 to vector<64x128xf32>
    %56 = arith.mulf %53, %55 : vector<64x128xf32>
    %57 = math.cos %56 : vector<64x128xf32>
    %cst_34 = arith.constant 0.0883883461 : f32
    %58 = vector.broadcast %cst_34 : f32 to vector<64x128xf32>
    %59 = arith.mulf %58, %57 : vector<64x128xf32>
    %c0_35 = arith.constant 0 : index
    %c0_36 = arith.constant 0 : index
    %60 = vector.load %arg13[%c0_35, %c0_36] : memref<64x256xf32, #tpu.memory_space<vmem>>, vector<64x128xf32>
    tpu.vector_store %arg13[%c0_35, %c0_36], %59 {strides = array<i32>} : memref<64x256xf32, #tpu.memory_space<vmem>>, vector<64x128xf32>,
    %61 = math.sin %56 : vector<64x128xf32>
    %cst_37 = arith.constant 0.0883883461 : f32
    %62 = vector.broadcast %cst_37 : f32 to vector<64x128xf32>
    %63 = arith.mulf %62, %61 : vector<64x128xf32>
    %c0_38 = arith.constant 0 : index
    %c128 = arith.constant 128 : index
    %64 = vector.load %arg13[%c0_38, %c128] : memref<64x256xf32, #tpu.memory_space<vmem>>, vector<64x128xf32>
    tpu.vector_store %arg13[%c0_38, %c128], %63 {strides = array<i32>} : memref<64x256xf32, #tpu.memory_space<vmem>>, vector<64x128xf32>,
    return
  }
  func.func @transform_0(%arg0: i32) -> i32 {
    %c0_i32 = arith.constant 0 : i32
    %c0_i32_0 = arith.constant 0 : i32
    return %c0_i32 : i32
  }
  func.func @transform_1(%arg0: i32) -> (i32, i32) {
    %c0_i32 = arith.constant 0 : i32
    %c0_i32_0 = arith.constant 0 : i32
    return %arg0, %c0_i32 : i32, i32
  }
  func.func @transform_2(%arg0: i32) -> (i32, i32) {
    %c0_i32 = arith.constant 0 : i32
    %c0_i32_0 = arith.constant 0 : i32
    %c0_i32_1 = arith.constant 0 : i32
    return %c0_i32, %c0_i32_0 : i32, i32
  }
  func.func @transform_3(%arg0: i32) -> (i32, i32) {
    %c0_i32 = arith.constant 0 : i32
    %c0_i32_0 = arith.constant 0 : i32
    %c0_i32_1 = arith.constant 0 : i32
    return %c0_i32, %c0_i32_0 : i32, i32
  }
  func.func @transform_4(%arg0: i32) -> (i32, i32) {
    %c0_i32 = arith.constant 0 : i32
    %c0_i32_0 = arith.constant 0 : i32
    %c0_i32_1 = arith.constant 0 : i32
    return %c0_i32, %c0_i32_0 : i32, i32
  }
  func.func @transform_5(%arg0: i32) -> (i32, i32) {
    %c0_i32 = arith.constant 0 : i32
    %c0_i32_0 = arith.constant 0 : i32
    %c0_i32_1 = arith.constant 0 : i32
    return %c0_i32, %c0_i32_0 : i32, i32
  }
  func.func @transform_6(%arg0: i32) -> (i32, i32) {
    %c0_i32 = arith.constant 0 : i32
    %c0_i32_0 = arith.constant 0 : i32
    %c0_i32_1 = arith.constant 0 : i32
    return %c0_i32, %c0_i32_0 : i32, i32
  }
  func.func @transform_7(%arg0: i32) -> (i32, i32) {
    %c0_i32 = arith.constant 0 : i32
    %c0_i32_0 = arith.constant 0 : i32
    %c0_i32_1 = arith.constant 0 : i32
    return %c0_i32, %c0_i32_0 : i32, i32
  }
  func.func @transform_8(%arg0: i32) -> (i32, i32) {
    %c0_i32 = arith.constant 0 : i32
    %c0_i32_0 = arith.constant 0 : i32
    %c0_i32_1 = arith.constant 0 : i32
    return %c0_i32, %c0_i32_0 : i32, i32
  }
  func.func @transform_9(%arg0: i32) -> (i32, i32) {
    %c0_i32 = arith.constant 0 : i32
    %c0_i32_0 = arith.constant 0 : i32
    %c0_i32_1 = arith.constant 0 : i32
    return %c0_i32, %c0_i32_0 : i32, i32
  }
  func.func @transform_10(%arg0: i32) -> (i32, i32) {
    %c0_i32 = arith.constant 0 : i32
    %c0_i32_0 = arith.constant 0 : i32
    %c0_i32_1 = arith.constant 0 : i32
    return %c0_i32, %c0_i32_0 : i32, i32
  }
  func.func @transform_11(%arg0: i32) -> (i32, i32) {
    %c0_i32 = arith.constant 0 : i32
    %c0_i32_0 = arith.constant 0 : i32
    %c0_i32_1 = arith.constant 0 : i32
    return %c0_i32, %c0_i32_0 : i32, i32
  }
  func.func @transform_12(%arg0: i32) -> (i32, i32) {
    %c0_i32 = arith.constant 0 : i32
    %c0_i32_0 = arith.constant 0 : i32
    return %arg0, %c0_i32 : i32, i32
  }
}

</mosaic_0001>

<bundles_post_ra>
// kernel: tpu_custom_call.1
= control target key start
LH: loop header
LB: loop body
LE: loop exit
PB: predicated region body
PF: predicated region fallthrough
CT: control target
= control target key end

     0   :  { %vm59_vm0 = vcmask 64512   ;;  %s4111_s0 = inlined_call_operand.<no memory space> [shape: f32[1], index: 0, kind: input, shape index: {}]   ;;  %s4112_s1 = inlined_call_operand.vmem [shape: f32[64,8], index: 1, kind: input, shape index: {}]   ;;  %s4113_s2 = inlined_call_operand.vmem [shape: f32[8,32], index: 2, kind: input, shape index: {}]   ;;  %s4114_s3 = inlined_call_operand.vmem [shape: f32[1,32], index: 3, kind: input, shape index: {}]   ;;  %s4115_s4 = inlined_call_operand.vmem [shape: f32[32,32], index: 4, kind: input, shape index: {}]   ;;  %s4116_s5 = inlined_call_operand.vmem [shape: f32[1,32], index: 5, kind: input, shape index: {}]   ;;  %s4117_s6 = inlined_call_operand.vmem [shape: f32[32,32], index: 6, kind: input, shape index: {}]   ;;  %s4118_s7 = inlined_call_operand.vmem [shape: f32[1,32], index: 7, kind: input, shape index: {}]   ;;  %s4119_s8 = inlined_call_operand.vmem [shape: f32[32,16], index: 8, kind: input, shape index: {}]   ;;  %s4120_s9 = inlined_call_operand.vmem [shape: f32[1,16], index: 9, kind: input, shape index: {}]   ;;  %s4121_s10 = inlined_call_operand.vmem [shape: f32[16,128], index: 10, kind: input, shape index: {}]   ;;  %s4122_s11 = inlined_call_operand.vmem [shape: f32[1,128], index: 11, kind: input, shape index: {}]   ;;  %s4123_s12 = inlined_call_operand.hbm [shape: f32[64,256], index: 12, kind: output, shape index: {}]  }
   0x1   :  { %v51_v0 = vld [vmem:[%s4113_s2] sm:$0xff]  ;;  %v44_v3 = vld [vmem:[%s4112_s1 + $0x8] sm:$0xff]  ;;  %v45_v5 = vld [vmem:[%s4112_s1 + $0x10] sm:$0xff] }
   0x2   :  { %v43_v1 = vld [vmem:[%s4112_s1] sm:$0xff]  ;;  %2838 = vmatprep.subr.mxu0 %v51_v0  ;;  %2928 = vmatprep.subr.mxu1 %v51_v0  ;;  %v48_v4 = vld [vmem:[%s4112_s1 + $0x28] sm:$0xff]  ;;  %v49_v6 = vld [vmem:[%s4112_s1 + $0x30] sm:$0xff] }
   0x3   :  { %v47_v2 = vld [vmem:[%s4112_s1 + $0x20] sm:$0xff]  ;;  %2839 = vmatpush3.msra.mxu0 %v51_v0  ;;  %2929 = vmatpush3.msra.mxu1 %v51_v0 }
   0x4   :  { %2840 = vmatprep.mubr.msk.f32.mxu0 %vm59_vm0, %v43_v1  ;;  %2846 = vmatprep.mubr.msk.f32.mxu1 %vm59_vm0, %v47_v2 }
   0x5   :  { %18 = vsyncpa [#allocation4], 0  ;;  %2841 = vmatmul.mubr.msk.f32.vlgmr.msra.gmra.mxu0 %vm59_vm0, %v44_v3  ;;  %2847 = vmatmul.mubr.msk.f32.vlgmr.msra.gmra.mxu1 %vm59_vm0, %v48_v4  ;;  %v46_v7 = vld [vmem:[%s4112_s1 + $0x18] sm:$0xff]  ;;  %v263_v10 = vld [vmem:[%s4115_s4 + $0x10] sm:$0xff]  ;;  %vm272_vm1 = vcmask 261120   ;;  %vm829_vm2 = vcmask 130048  }
   0x6   :  { %2843 = vmatprep.mubr.msk.f32.mxu0 %vm59_vm0, %v45_v5  ;;  %2849 = vmatprep.mubr.msk.f32.mxu1 %vm59_vm0, %v49_v6  ;;  %v50_v8 = vld [vmem:[%s4112_s1 + $0x38] sm:$0xff]  ;;  %v262_v11 = vld [vmem:[%s4115_s4 + $0x8] sm:$0xff]  ;;  %v261_v12 = vld [vmem:[%s4115_s4] sm:$0xff] }
   0x7   :  { %v264_v9 = vld [vmem:[%s4115_s4 + $0x18] sm:$0xff]  ;;  %v2675_v13 = vld [vmem:[%s4114_s3] ss:$0 sm:$0xff] }
   0x8   :  { %2852 = vmatprep.subr.mxu1 %v264_v9 }
   0x9   :  { %2844 = vmatmul.mubr.msk.f32.gmra.mxu0 %vm59_vm0, %v46_v7  ;;  %2850 = vmatmul.mubr.msk.f32.gmra.mxu1 %vm59_vm0, %v50_v8 }
   0xa   :  { %2853 = vmatpush3.msra.mxu1 %v264_v9 }
   0xb   :  { %2854 = vmatprep.subr.mxu1 %v263_v10 }
   0xc   :  { %2855 = vmatpush3.msra.mxu1 %v263_v10 }
   0xd   :  { %2856 = vmatprep.subr.mxu1 %v262_v11 }
   0xe   :  { %2857 = vmatpush3.msra.mxu1 %v262_v11 }
   0xf   :  { %2858 = vmatprep.subr.mxu1 %v261_v12 }
  0x10   :  { %2859 = vmatpush3.msra.mxu1 %v261_v12 }
  0xc5   :  { %v2842_v14 = vpop.f32.mrf.mxu0  ;;  %v2848_v15 = vpop.f32.mrf.mxu1 }
  0xc6   :  { %v3249_v16 = vadd.f32 %v2842_v14, %v2675_v13  ;;  %v3251_v17 = vadd.f32 %v2848_v15, %v2675_v13 }
  0xc7   :  { %v150_v18 = vpop.f32.mrf.mxu0  ;;  %v170_v19 = vpop.f32.mrf.mxu1 }
  0xc8   :  { %v198_v20 = vand.u32 2147483647, %v3249_v16  ;;  %v202_v21 = vand.u32 2147483647, %v3251_v17  ;;  %v3255_v22 = vadd.f32 %v2675_v13, %v150_v18  ;;  %v3257_v23 = vadd.f32 %v2675_v13, %v170_v19 }
  0xc9   :  { %v2845_v24 = vpop.f32.mrf.mxu0  ;;  %v2851_v25 = vpop.f32.mrf.mxu1  ;;  %v190_v12 = vmax.f32 %v3249_v16, 0.0 }
  0xca   :  { %v206_v26 = vsub.f32 0.0, %v198_v20  ;;  %v210_v27 = vsub.f32 0.0, %v202_v21  ;;  %v3259_v28 = vadd.f32 %v2845_v24, %v2675_v13  ;;  %v3261_v29 = vadd.f32 %v2851_v25, %v2675_v13 }
  0xcb   :  { %v197_v30 = vand.u32 2147483647, %v3255_v22  ;;  %v201_v31 = vand.u32 2147483647, %v3257_v23  ;;  %v160_v32 = vpop.f32.mrf.mxu0  ;;  %v180_v33 = vpop.f32.mrf.mxu1  ;;  %v189_v9 = vmax.f32 %v3255_v22, 0.0  ;;  %v193_v16 = vmax.f32 %v3257_v23, 0.0 }
  0xcc   :  { %v215_v34 = vmul.f32 1.442695, %v206_v26  ;;  %v223_v35 = vmul.f32 1.442695, %v210_v27  ;;  %v200_v38 = vand.u32 2147483647, %v3259_v28  ;;  %v3267_v40 = vadd.f32 %v2675_v13, %v160_v32 }
  0xcd   :  { %v205_v36 = vsub.f32 0.0, %v197_v30  ;;  %v209_v37 = vsub.f32 0.0, %v201_v31  ;;  %v204_v39 = vand.u32 2147483647, %v3261_v29  ;;  %v3269_v41 = vadd.f32 %v2675_v13, %v180_v33 }
  0xce   :  { %2973 = vpow2.f32 %v215_v34  ;;  %v208_v44 = vsub.f32 0.0, %v200_v38  ;;  %v199_v46 = vand.u32 2147483647, %v3267_v40  ;;  %v191_v24 = vmax.f32 %v3267_v40, 0.0  ;;  %v476_v40 = vld [vmem:[%s4117_s6 + $0x10] sm:$0xff] }
  0xcf   :  { %v213_v42 = vmul.f32 1.442695, %v205_v36  ;;  %v221_v43 = vmul.f32 1.442695, %v209_v37  ;;  %2975 = vpow2.f32 %v223_v35  ;;  %v212_v45 = vsub.f32 0.0, %v204_v39 }
  0xd0   :  { %v219_v47 = vmul.f32 1.442695, %v208_v44  ;;  %v203_v48 = vand.u32 2147483647, %v3269_v41  ;;  %v207_v50 = vsub.f32 0.0, %v199_v46  ;;  %v192_v26 = vmax.f32 %v3259_v28, 0.0 }
  0xd1   :  { %2977 = vpow2.f32 %v213_v42  ;;  %v227_v49 = vmul.f32 1.442695, %v212_v45  ;;  %v194_v35 = vmax.f32 %v3251_v17, 0.0  ;;  %v195_v36 = vmax.f32 %v3269_v41, 0.0  ;;  %v477_v17 = vld [vmem:[%s4117_s6 + $0x18] sm:$0xff]  ;;  %v474_v41 = vld [vmem:[%s4117_s6] sm:$0xff] }
  0xd2   :  { %2979 = vpow2.f32 %v221_v43  ;;  %v211_v51 = vsub.f32 0.0, %v203_v48  ;;  %v217_v52 = vmul.f32 1.442695, %v207_v50  ;;  %v196_v23 = vmax.f32 %v3261_v29, 0.0  ;;  %2872 = vmatprep.subr.mxu0 %v477_v17  ;;  %v475_v29 = vld [vmem:[%s4117_s6 + $0x8] sm:$0xff] }
  0xd3   :  { %2981 = vpow2.f32 %v219_v47  ;;  %2873 = vmatpush3.msra.mxu0 %v477_v17  ;;  %v2684_v42 = vld [vmem:[%s4116_s5] ss:$0 sm:$0xff] }
  0xd4   :  { %2983 = vpow2.f32 %v227_v49  ;;  %v225_v53 = vmul.f32 1.442695, %v211_v51  ;;  %2874 = vmatprep.subr.mxu0 %v476_v40 }
  0xd5   :  { %2985 = vpow2.f32 %v217_v52  ;;  %2875 = vmatpush3.msra.mxu0 %v476_v40 }
  0xd6   :  { %2987 = vpow2.f32 %v225_v53  ;;  %2876 = vmatprep.subr.mxu0 %v475_v29 }
  0xd7   :  { %2877 = vmatpush3.msra.mxu0 %v475_v29 }
  0xd8   :  { %2878 = vmatprep.subr.mxu0 %v474_v41 }
  0xd9   :  { %2879 = vmatpush3.msra.mxu0 %v474_v41 }
  0xdb   :  { %v2974_v54 = vpop.eup %2973 }
  0xdc   :  { %v230_v55 = vadd.f32 1.0, %v2974_v54  ;;  %v2976_v56 = vpop.eup %2975 }
  0xdd   :  { %v234_v1 = vadd.f32 1.0, %v2976_v56 }
  0xde   :  { %v2978_v57 = vpop.eup %2977  ;;  %2989 = vlog2.f32 %v230_v55 }
  0xdf   :  { %v2980_v58 = vpop.eup %2979  ;;  %v229_v59 = vadd.f32 1.0, %v2978_v57 }
  0xe0   :  { %v2982_v60 = vpop.eup %2981  ;;  %v233_v61 = vadd.f32 1.0, %v2980_v58 }
  0xe1   :  { %2991 = vlog2.f32 %v229_v59  ;;  %v232_v62 = vadd.f32 1.0, %v2982_v60  ;;  %v2984_v63 = vpop.eup %2983 }
  0xe2   :  { %v2986_v0 = vpop.eup %2985  ;;  %v236_v5 = vadd.f32 1.0, %v2984_v63 }
  0xe3   :  { %2993 = vlog2.f32 %v232_v62  ;;  %v2988_v2 = vpop.eup %2987  ;;  %v231_v3 = vadd.f32 1.0, %v2986_v0 }
  0xe4   :  { %2995 = vlog2.f32 %v233_v61  ;;  %v235_v4 = vadd.f32 1.0, %v2988_v2 }
  0xe5   :  { %2997 = vlog2.f32 %v231_v3 }
  0xe6   :  { %2999 = vlog2.f32 %v234_v1 }
  0xe7   :  { %3001 = vlog2.f32 %v235_v4 }
  0xe8   :  { %3003 = vlog2.f32 %v236_v5 }
  0xeb   :  { %v2990_v6 = vpop.eup %2989 }
  0xec   :  { %v240_v8 = vmul.f32 0.6931472, %v2990_v6 }
  0xee   :  { %v2992_v7 = vpop.eup %2991  ;;  %v254_v15 = vadd.f32 %v240_v8, %v190_v12 }
  0xef   :  { %v238_v10 = vmul.f32 0.6931472, %v2992_v7 }
  0xf0   :  { %v2994_v11 = vpop.eup %2993 }
  0xf1   :  { %v2996_v13 = vpop.eup %2995  ;;  %v253_v14 = vadd.f32 %v238_v10, %v189_v9  ;;  %v244_v19 = vmul.f32 0.6931472, %v2994_v11 }
  0xf2   :  { %v2998_v18 = vpop.eup %2997  ;;  %v246_v21 = vmul.f32 0.6931472, %v2996_v13 }
  0xf3   :  { %2860 = vmatprep.mubr.msk.f32.mxu1 %vm272_vm1, %v253_v14  ;;  %v3000_v20 = vpop.eup %2999  ;;  %v242_v25 = vmul.f32 0.6931472, %v2998_v18  ;;  %v256_v31 = vadd.f32 %v244_v19, %v192_v26 }
  0xf4   :  { %2861 = vmatmul.mubr.msk.f32.vlgmr.msra.gmra.mxu1 %vm272_vm1, %v254_v15  ;;  %v3002_v22 = vpop.eup %3001  ;;  %v248_v30 = vmul.f32 0.6931472, %v3000_v20  ;;  %v257_v33 = vadd.f32 %v246_v21, %v193_v16 }
  0xf5   :  { %v255_v27 = vadd.f32 %v242_v25, %v191_v24  ;;  %v3004_v32 = vpop.eup %3003  ;;  %v250_v34 = vmul.f32 0.6931472, %v3002_v22 }
  0xf6   :  { %v258_v37 = vadd.f32 %v248_v30, %v194_v35  ;;  %v252_v28 = vmul.f32 0.6931472, %v3004_v32 }
  0xf7   :  { %2863 = vmatprep.mubr.msk.f32.mxu1 %vm272_vm1, %v255_v27  ;;  %v259_v38 = vadd.f32 %v250_v34, %v195_v36 }
  0xf8   :  { %2864 = vmatmul.mubr.msk.f32.gmra.mxu1 %vm272_vm1, %v256_v31  ;;  %v260_v39 = vadd.f32 %v252_v28, %v196_v23 }
  0xf9   :  { %2866 = vmatprep.mubr.msk.f32.mxu1 %vm272_vm1, %v257_v33 }
  0xfc   :  { %2867 = vmatmul.mubr.msk.f32.gmra.mxu1 %vm272_vm1, %v258_v37 }
  0xfd   :  { %2869 = vmatprep.mubr.msk.f32.mxu1 %vm272_vm1, %v259_v38 }
 0x100   :  { %2870 = vmatmul.mubr.msk.f32.gmra.mxu1 %vm272_vm1, %v260_v39 }
 0x1b4   :  { %v2862_v43 = vpop.f32.mrf.mxu1 }
 0x1b5   :  { %v3304_v44 = vadd.f32 %v2862_v43, %v2684_v42 }
 0x1b6   :  { %v363_v45 = vpop.f32.mrf.mxu1 }
 0x1b7   :  { %v411_v46 = vand.u32 2147483647, %v3304_v44  ;;  %v3307_v47 = vadd.f32 %v2684_v42, %v363_v45  ;;  %v403_v29 = vmax.f32 %v3304_v44, 0.0 }
 0x1b8   :  { %v2865_v50 = vpop.f32.mrf.mxu1 }
 0x1b9   :  { %v419_v48 = vsub.f32 0.0, %v411_v46  ;;  %v410_v49 = vand.u32 2147483647, %v3307_v47  ;;  %v3310_v51 = vadd.f32 %v2865_v50, %v2684_v42  ;;  %v402_v17 = vmax.f32 %v3307_v47, 0.0 }
 0x1ba   :  { %v373_v54 = vpop.f32.mrf.mxu1 }
 0x1bb   :  { %v428_v52 = vmul.f32 1.442695, %v419_v48  ;;  %v418_v53 = vsub.f32 0.0, %v410_v49  ;;  %v413_v55 = vand.u32 2147483647, %v3310_v51  ;;  %v3313_v56 = vadd.f32 %v2684_v42, %v373_v54 }
 0x1bc   :  { %v2868_v58 = vpop.f32.mrf.mxu1 }
 0x1bd   :  { %3005 = vpow2.f32 %v428_v52  ;;  %v426_v57 = vmul.f32 1.442695, %v418_v53  ;;  %v421_v59 = vsub.f32 0.0, %v413_v55  ;;  %v412_v60 = vand.u32 2147483647, %v3313_v56 }
 0x1be   :  { %v3316_v61 = vadd.f32 %v2868_v58, %v2684_v42  ;;  %v383_v62 = vpop.f32.mrf.mxu1  ;;  %v404_v48 = vmax.f32 %v3313_v56, 0.0  ;;  %v405_v52 = vmax.f32 %v3310_v51, 0.0 }
 0x1bf   :  { %3007 = vpow2.f32 %v426_v57  ;;  %v432_v63 = vmul.f32 1.442695, %v421_v59  ;;  %v420_v0 = vsub.f32 0.0, %v412_v60  ;;  %v3319_v2 = vadd.f32 %v2684_v42, %v383_v62 }
 0x1c0   :  { %v415_v1 = vand.u32 2147483647, %v3316_v61  ;;  %v2871_v3 = vpop.f32.mrf.mxu1  ;;  %v407_v56 = vmax.f32 %v3316_v61, 0.0  ;;  %v689_v61 = vld [vmem:[%s4119_s8 + $0x18] sm:$0xff] }
 0x1c1   :  { %3009 = vpow2.f32 %v432_v63  ;;  %v430_v4 = vmul.f32 1.442695, %v420_v0  ;;  %v3321_v6 = vadd.f32 %v2871_v3, %v2684_v42  ;;  %v414_v7 = vand.u32 2147483647, %v3319_v2  ;;  %2892 = vmatprep.subr.mxu1 %v689_v61 }
 0x1c2   :  { %v423_v5 = vsub.f32 0.0, %v415_v1  ;;  %v393_v8 = vpop.f32.mrf.mxu1  ;;  %v406_v55 = vmax.f32 %v3319_v2, 0.0  ;;  %2893 = vmatpush3.msra.mxu1 %v689_v61 }
 0x1c3   :  { %3011 = vpow2.f32 %v430_v4  ;;  %v417_v10 = vand.u32 2147483647, %v3321_v6  ;;  %v422_v11 = vsub.f32 0.0, %v414_v7  ;;  %v3325_v12 = vadd.f32 %v2684_v42, %v393_v8  ;;  %v688_v4 = vld [vmem:[%s4119_s8 + $0x10] sm:$0xff]  ;;  %v828_v7 = vld [vmem:[%s4121_s10 + $0x8] sm:$0xff]  ;;  %v827_v8 = vld [vmem:[%s4121_s10] sm:$0xff] }
 0x1c4   :  { %v436_v9 = vmul.f32 1.442695, %v423_v5  ;;  %v409_v1 = vmax.f32 %v3321_v6, 0.0  ;;  %2894 = vmatprep.subr.mxu1 %v688_v4  ;;  %v687_v5 = vld [vmem:[%s4119_s8 + $0x8] sm:$0xff]  ;;  %v686_v6 = vld [vmem:[%s4119_s8] sm:$0xff]  ;;  %2912 = vmatprep.subr.mxu0 %v828_v7 }
 0x1c5   :  { %v425_v13 = vsub.f32 0.0, %v417_v10  ;;  %v434_v14 = vmul.f32 1.442695, %v422_v11  ;;  %v416_v15 = vand.u32 2147483647, %v3325_v12  ;;  %v408_v51 = vmax.f32 %v3325_v12, 0.0  ;;  %2895 = vmatpush3.msra.mxu1 %v688_v4 }
 0x1c6   :  { %3013 = vpow2.f32 %v436_v9  ;;  %2896 = vmatprep.subr.mxu1 %v687_v5  ;;  %v2693_v9 = vld [vmem:[%s4118_s7] ss:$0 sm:$0xff] }
 0x1c7   :  { %v440_v18 = vmul.f32 1.442695, %v425_v13  ;;  %3015 = vpow2.f32 %v434_v14  ;;  %v424_v19 = vsub.f32 0.0, %v416_v15  ;;  %2897 = vmatpush3.msra.mxu1 %v687_v5 }
 0x1c8   :  { %2898 = vmatprep.subr.mxu1 %v686_v6 }
 0x1c9   :  { %3017 = vpow2.f32 %v440_v18  ;;  %v438_v24 = vmul.f32 1.442695, %v424_v19  ;;  %2899 = vmatpush3.msra.mxu1 %v686_v6 }
 0x1ca   :  { %v3006_v20 = vpop.eup %3005 }
 0x1cb   :  { %v443_v21 = vadd.f32 1.0, %v3006_v20 }
 0x1cc   :  { %v3008_v25 = vpop.eup %3007 }
 0x1cd   :  { %3019 = vlog2.f32 %v443_v21  ;;  %v442_v22 = vadd.f32 1.0, %v3008_v25 }
 0x1ce   :  { %3021 = vpow2.f32 %v438_v24  ;;  %v3010_v26 = vpop.eup %3009 }
 0x1cf   :  { %3023 = vlog2.f32 %v442_v22  ;;  %v445_v16 = vadd.f32 1.0, %v3010_v26 }
 0x1d0   :  { %v3012_v27 = vpop.eup %3011 }
 0x1d1   :  { %3025 = vlog2.f32 %v445_v16  ;;  %v444_v30 = vadd.f32 1.0, %v3012_v27 }
 0x1d3   :  { %v3014_v31 = vpop.eup %3013  ;;  %3027 = vlog2.f32 %v444_v30 }
 0x1d4   :  { %v447_v32 = vadd.f32 1.0, %v3014_v31  ;;  %v3016_v33 = vpop.eup %3015 }
 0x1d5   :  { %v446_v35 = vadd.f32 1.0, %v3016_v33 }
 0x1d6   :  { %3029 = vlog2.f32 %v447_v32  ;;  %v3018_v34 = vpop.eup %3017 }
 0x1d7   :  { %v449_v36 = vadd.f32 1.0, %v3018_v34  ;;  %3031 = vlog2.f32 %v446_v35 }
 0x1d9   :  { %3033 = vlog2.f32 %v449_v36 }
 0x1da   :  { %v3020_v37 = vpop.eup %3019 }
 0x1db   :  { %v3022_v28 = vpop.eup %3021  ;;  %v453_v23 = vmul.f32 0.6931472, %v3020_v37 }
 0x1dc   :  { %v3024_v38 = vpop.eup %3023  ;;  %v448_v39 = vadd.f32 1.0, %v3022_v28 }
 0x1dd   :  { %v451_v40 = vmul.f32 0.6931472, %v3024_v38  ;;  %v467_v43 = vadd.f32 %v453_v23, %v403_v29 }
 0x1de   :  { %3035 = vlog2.f32 %v448_v39  ;;  %v3026_v41 = vpop.eup %3025 }
 0x1df   :  { %v466_v42 = vadd.f32 %v451_v40, %v402_v17  ;;  %v457_v46 = vmul.f32 0.6931472, %v3026_v41 }
 0x1e0   :  { %v3028_v45 = vpop.eup %3027 }
 0x1e1   :  { %2880 = vmatprep.mubr.msk.f32.mxu0 %vm272_vm1, %v466_v42  ;;  %v455_v49 = vmul.f32 0.6931472, %v3028_v45  ;;  %v469_v53 = vadd.f32 %v457_v46, %v405_v52 }
 0x1e2   :  { %2881 = vmatmul.mubr.msk.f32.vlgmr.msra.gmra.mxu0 %vm272_vm1, %v467_v43 }
 0x1e3   :  { %v3030_v50 = vpop.eup %3029  ;;  %v468_v47 = vadd.f32 %v455_v49, %v404_v48  ;;  %2913 = vmatpush3.msra.mxu0 %v828_v7 }
 0x1e4   :  { %v3032_v54 = vpop.eup %3031  ;;  %v461_v44 = vmul.f32 0.6931472, %v3030_v50  ;;  %2914 = vmatprep.subr.mxu0 %v827_v8 }
 0x1e5   :  { %2883 = vmatprep.mubr.msk.f32.mxu0 %vm272_vm1, %v468_v47  ;;  %v459_v57 = vmul.f32 0.6931472, %v3032_v54  ;;  %2915 = vmatpush3.msra.mxu0 %v827_v8 }
 0x1e6   :  { %2884 = vmatmul.mubr.msk.f32.gmra.mxu0 %vm272_vm1, %v469_v53  ;;  %v3034_v58 = vpop.eup %3033  ;;  %v471_v60 = vadd.f32 %v461_v44, %v407_v56 }
 0x1e7   :  { %v470_v59 = vadd.f32 %v459_v57, %v406_v55  ;;  %v465_v63 = vmul.f32 0.6931472, %v3034_v58 }
 0x1e9   :  { %2886 = vmatprep.mubr.msk.f32.mxu0 %vm272_vm1, %v470_v59  ;;  %v473_v3 = vadd.f32 %v465_v63, %v409_v1 }
 0x1ea   :  { %2887 = vmatmul.mubr.msk.f32.gmra.mxu0 %vm272_vm1, %v471_v60 }
 0x1eb   :  { %v3036_v62 = vpop.eup %3035 }
 0x1ec   :  { %v463_v0 = vmul.f32 0.6931472, %v3036_v62 }
 0x1ee   :  { %v472_v2 = vadd.f32 %v463_v0, %v408_v51 }
 0x1f0   :  { %2889 = vmatprep.mubr.msk.f32.mxu0 %vm272_vm1, %v472_v2 }
 0x1f1   :  { %2890 = vmatmul.mubr.msk.f32.gmra.mxu0 %vm272_vm1, %v473_v3 }
 0x2a2   :  { %v2882_v10 = vpop.f32.mrf.mxu0 }
 0x2a3   :  { %v3365_v11 = vadd.f32 %v2882_v10, %v2693_v9 }
 0x2a4   :  { %v575_v12 = vpop.f32.mrf.mxu0 }
 0x2a5   :  { %v623_v13 = vand.u32 2147483647, %v3365_v11  ;;  %v3368_v14 = vadd.f32 %v2693_v9, %v575_v12  ;;  %v615_v7 = vmax.f32 %v3365_v11, 0.0 }
 0x2a6   :  { %v2885_v19 = vpop.f32.mrf.mxu0 }
 0x2a7   :  { %v631_v15 = vsub.f32 0.0, %v623_v13  ;;  %v622_v18 = vand.u32 2147483647, %v3368_v14  ;;  %v3371_v20 = vadd.f32 %v2885_v19, %v2693_v9  ;;  %v614_v5 = vmax.f32 %v3368_v14, 0.0 }
 0x2a8   :  { %v585_v25 = vpop.f32.mrf.mxu0 }
 0x2a9   :  { %v640_v21 = vmul.f32 1.442695, %v631_v15  ;;  %v630_v24 = vsub.f32 0.0, %v622_v18  ;;  %v625_v22 = vand.u32 2147483647, %v3371_v20  ;;  %v3374_v26 = vadd.f32 %v2693_v9, %v585_v25 }
 0x2aa   :  { %v2888_v31 = vpop.f32.mrf.mxu0  ;;  %v617_v19 = vmax.f32 %v3371_v20, 0.0 }
 0x2ab   :  { %3037 = vpow2.f32 %v640_v21  ;;  %v638_v16 = vmul.f32 1.442695, %v630_v24  ;;  %v633_v27 = vsub.f32 0.0, %v625_v22  ;;  %v624_v30 = vand.u32 2147483647, %v3374_v26 }
 0x2ac   :  { %v3377_v32 = vadd.f32 %v2888_v31, %v2693_v9  ;;  %v595_v35 = vpop.f32.mrf.mxu0  ;;  %v616_v15 = vmax.f32 %v3374_v26, 0.0 }
 0x2ad   :  { %3039 = vpow2.f32 %v638_v16  ;;  %v644_v33 = vmul.f32 1.442695, %v633_v27  ;;  %v632_v34 = vsub.f32 0.0, %v624_v30  ;;  %v3380_v37 = vadd.f32 %v2693_v9, %v595_v35 }
 0x2ae   :  { %v627_v36 = vand.u32 2147483647, %v3377_v32  ;;  %v619_v27 = vmax.f32 %v3377_v32, 0.0  ;;  %v959_v32 = vstv %s4111_s0 }
 0x2af   :  { %3041 = vpow2.f32 %v644_v33  ;;  %v642_v28 = vmul.f32 1.442695, %v632_v34  ;;  %v626_v23 = vand.u32 2147483647, %v3380_v37  ;;  %v618_v22 = vmax.f32 %v3380_v37, 0.0 }
 0x2b0   :  { %v635_v38 = vsub.f32 0.0, %v627_v36 }
 0x2b1   :  { %v2891_v39 = vpop.f32.mrf.mxu0  ;;  %3043 = vpow2.f32 %v642_v28  ;;  %v634_v29 = vsub.f32 0.0, %v626_v23 }
 0x2b2   :  { %v3383_v17 = vadd.f32 %v2891_v39, %v2693_v9  ;;  %v648_v40 = vmul.f32 1.442695, %v635_v38  ;;  %v2702_v39 = vld [vmem:[%s4120_s9] ss:$0 sm:$0xff]  ;;  %s3131_s9 = smov [#allocation3]  }
 0x2b3   :  { %v605_v41 = vpop.f32.mrf.mxu0  ;;  %v646_v45 = vmul.f32 1.442695, %v634_v29  ;;  %s2664_s3 = sshll.u32 %s3131_s9, 4  ;;  %s2665_s3 = int_to_ptr.vmem [resolvable:$true] %s2664_s3 }
 0x2b4   :  { %v629_v42 = vand.u32 2147483647, %v3383_v17  ;;  %v3386_v43 = vadd.f32 %v2693_v9, %v605_v41  ;;  %3045 = vpow2.f32 %v648_v40  ;;  %v621_v36 = vmax.f32 %v3383_v17, 0.0  ;;  %s3103_s4 = scalar_lea.vmem %s2665_s3, 2048  ;;  %p3108_p1 = scmp.lt.s32.totalorder %s2665_s3, %s2665_s3 }
 0x2b5   :  { %3047 = vpow2.f32 %v646_v45  ;;  %p3104_p0 = scmp.ne.s32.totalorder %s2665_s3, %s3103_s4  ;;  %p3109_p2 = scmp.lt.s32.totalorder %s3103_s4, %s3103_s4 }
 0x2b6   :  { %v637_v46 = vsub.f32 0.0, %v629_v42  ;;  %v628_v48 = vand.u32 2147483647, %v3386_v43  ;;  %v620_v20 = vmax.f32 %v3386_v43, 0.0 }
 0x2b7   :  { %p3110_p3 = por %p3109_p2, %p3108_p1 }
 0x2b8   :  { %v3038_v49 = vpop.eup %3037  ;;  %v652_v50 = vmul.f32 1.442695, %v637_v46  ;;  %v636_v52 = vsub.f32 0.0, %v628_v48 }
 0x2b9   :  { %v655_v47 = vadd.f32 1.0, %v3038_v49  ;;  %p3111_p4 = pnand %p3110_p3, %p3104_p0 }
 0x2ba   :  { %v3040_v53 = vpop.eup %3039  ;;  %3049 = vpow2.f32 %v652_v50  ;;  %v650_v54 = vmul.f32 1.442695, %v636_v52 }
 0x2bb   :  { %3051 = vlog2.f32 %v655_v47  ;;  %v654_v44 = vadd.f32 1.0, %v3040_v53 }
 0x2bc   :  { %3053 = vpow2.f32 %v650_v54  ;;  %v3042_v55 = vpop.eup %3041 }
 0x2bd   :  { %3055 = vlog2.f32 %v654_v44  ;;  %v657_v57 = vadd.f32 1.0, %v3042_v55 }
 0x2be   :  { %v3044_v58 = vpop.eup %3043 }
 0x2bf   :  { %3057 = vlog2.f32 %v657_v57  ;;  %v656_v56 = vadd.f32 1.0, %v3044_v58 }
 0x2c1   :  { %v3046_v59 = vpop.eup %3045  ;;  %3059 = vlog2.f32 %v656_v56 }
 0x2c2   :  { %v659_v60 = vadd.f32 1.0, %v3046_v59  ;;  %v3048_v62 = vpop.eup %3047 }
 0x2c3   :  { %v658_v63 = vadd.f32 1.0, %v3048_v62 }
 0x2c4   :  { %3061 = vlog2.f32 %v659_v60 }
 0x2c5   :  { %3063 = vlog2.f32 %v658_v63 }
 0x2c7   :  { %v3050_v51 = vpop.eup %3049 }
 0x2c8   :  { %v3052_v0 = vpop.eup %3051  ;;  %v661_v1 = vadd.f32 1.0, %v3050_v51 }
 0x2c9   :  { %v3054_v2 = vpop.eup %3053  ;;  %v665_v61 = vmul.f32 0.6931472, %v3052_v0 }
 0x2ca   :  { %v3056_v3 = vpop.eup %3055  ;;  %3065 = vlog2.f32 %v661_v1  ;;  %v660_v4 = vadd.f32 1.0, %v3054_v2 }
 0x2cb   :  { %v663_v6 = vmul.f32 0.6931472, %v3056_v3  ;;  %v679_v10 = vadd.f32 %v665_v61, %v615_v7 }
 0x2cc   :  { %3067 = vlog2.f32 %v660_v4  ;;  %v3058_v8 = vpop.eup %3057 }
 0x2cd   :  { %v678_v9 = vadd.f32 %v663_v6, %v614_v5  ;;  %v669_v13 = vmul.f32 0.6931472, %v3058_v8  ;;  %3069 = vrcp.f32 %v959_v32 }
 0x2ce   :  { %v3060_v12 = vpop.eup %3059 }
 0x2cf   :  { %2900 = vmatprep.mubr.msk.f32.mxu1 %vm272_vm1, %v678_v9  ;;  %v667_v18 = vmul.f32 0.6931472, %v3060_v12  ;;  %v681_v24 = vadd.f32 %v669_v13, %v617_v19 }
 0x2d0   :  { %2901 = vmatmul.mubr.msk.f32.vlgmr.msra.gmra.mxu1 %vm272_vm1, %v679_v10 }
 0x2d1   :  { %v3062_v21 = vpop.eup %3061  ;;  %v680_v14 = vadd.f32 %v667_v18, %v616_v15 }
 0x2d2   :  { %v3064_v25 = vpop.eup %3063  ;;  %v673_v11 = vmul.f32 0.6931472, %v3062_v21 }
 0x2d3   :  { %2903 = vmatprep.mubr.msk.f32.mxu1 %vm272_vm1, %v680_v14  ;;  %v671_v16 = vmul.f32 0.6931472, %v3064_v25 }
 0x2d4   :  { %2904 = vmatmul.mubr.msk.f32.gmra.mxu1 %vm272_vm1, %v681_v24  ;;  %v683_v31 = vadd.f32 %v673_v11, %v619_v27  ;;  %v3125_v11 = vmov 683565275  }
 0x2d5   :  { %v682_v30 = vadd.f32 %v671_v16, %v618_v22  ;;  %v3126_v16 = vmov 2475754826  }
 0x2d7   :  { %v3066_v26 = vpop.eup %3065  ;;  %2906 = vmatprep.mubr.msk.f32.mxu1 %vm272_vm1, %v682_v30 }
 0x2d8   :  { %v677_v34 = vmul.f32 0.6931472, %v3066_v26  ;;  %2907 = vmatmul.mubr.msk.f32.gmra.mxu1 %vm272_vm1, %v683_v31  ;;  %v3127_v26 = vmov 2131351028   ;;  %v3128_v31 = vmov 2102212464  }
 0x2d9   :  { %v3068_v33 = vpop.eup %3067 }
 0x2da   :  { %v675_v35 = vmul.f32 0.6931472, %v3068_v33  ;;  %v685_v28 = vadd.f32 %v677_v34, %v621_v36  ;;  %v3070_v38 = vpop.eup %3069  ;;  %v3129_v34 = vmov 920167782  }
 0x2db   :  { %2930 = vpush %v3070_v38  ;;  %v3130_v38 = vmov 1326507024  }
 0x2dc   :  { %v684_v37 = vadd.f32 %v675_v35, %v620_v20 }
 0x2de   :  { %2909 = vmatprep.mubr.msk.f32.mxu1 %vm272_vm1, %v684_v37 }
 0x2df   :  { %2910 = vmatmul.mubr.msk.f32.gmra.mxu1 %vm272_vm1, %v685_v28 }
 0x30c   :  { %s2931_s0 = spop %2930 }
 0x30d   :  { %v3419_v44 = vstv %s2931_s0 }
 0x390   :  { %v2902_v23 = vpop.f32.mrf.mxu1 }
 0x391   :  { %v793_v29 = vadd.f32 %v2902_v23, %v2702_v39 }
 0x392   :  { %v787_v40 = vpop.f32.mrf.mxu1 }
 0x393   :  { %v788_v17 = vadd.f32 %v2702_v39, %v787_v40 }
 0x394   :  { %v2905_v41 = vpop.f32.mrf.mxu1 }
 0x395   :  { %2916 = vmatprep.mubr.msk.f32.mxu0 %vm829_vm2, %v788_v17  ;;  %v803_v45 = vadd.f32 %v2905_v41, %v2702_v39 }
 0x396   :  { %2917 = vmatmul.mubr.msk.f32.vlgmr.msra.gmra.mxu0 %vm829_vm2, %v793_v29  ;;  %v797_v42 = vpop.f32.mrf.mxu1 }
 0x397   :  { %v798_v43 = vadd.f32 %v2702_v39, %v797_v42 }
 0x398   :  { %v2908_v46 = vpop.f32.mrf.mxu1 }
 0x399   :  { %2919 = vmatprep.mubr.msk.f32.mxu0 %vm829_vm2, %v798_v43  ;;  %v813_v50 = vadd.f32 %v2908_v46, %v2702_v39 }
 0x39a   :  { %2920 = vmatmul.mubr.msk.f32.gmra.mxu0 %vm829_vm2, %v803_v45  ;;  %v807_v48 = vpop.f32.mrf.mxu1 }
 0x39b   :  { %v808_v49 = vadd.f32 %v2702_v39, %v807_v48 }
 0x39d   :  { %2922 = vmatprep.mubr.msk.f32.mxu0 %vm829_vm2, %v808_v49 }
 0x39e   :  { %2923 = vmatmul.mubr.msk.f32.gmra.mxu0 %vm829_vm2, %v813_v50 }
 0x39f   :  { %v2911_v52 = vpop.f32.mrf.mxu1 }
 0x3a0   :  { %v823_v54 = vadd.f32 %v2911_v52, %v2702_v39 }
 0x3a1   :  { %v817_v47 = vpop.f32.mrf.mxu1 }
 0x3a2   :  { %v818_v53 = vadd.f32 %v2702_v39, %v817_v47 }
 0x3a4   :  { %2925 = vmatprep.mubr.msk.f32.mxu0 %vm829_vm2, %v818_v53 }
 0x3a5   :  { %2926 = vmatmul.mubr.msk.f32.gmra.mxu0 %vm829_vm2, %v823_v54 }
 0x456   :  { %v2918_v55 = vpop.f32.mrf.mxu0 }
 0x457   :  { %v3422_v57 = vmul.f32 %v2918_v55, %v3419_v44 }
 0x458   :  { %v920_v58 = vpop.f32.mrf.mxu0 }
 0x459   :  { %v1074_v56 = vand.u32 2147483647, %v3422_v57  ;;  %v1077_v59 = vand.u32 2139095040, %v3422_v57  ;;  %v3427_v60 = vmul.f32 %v3419_v44, %v920_v58  ;;  %vm1076_vm0 = vcmp.lt.s32.totalorder %v3422_v57, 0 }
 0x45a   :  { %v2921_v63 = vpop.f32.mrf.mxu0 }
 0x45b   :  { %v1078_v62 = vshrl.u32 %v1077_v59, 23  ;;  %v1081_v51 = vand.u32 8388607, %v1074_v56  ;;  %v971_v0 = vand.u32 2147483647, %v3427_v60  ;;  %v974_v1 = vand.u32 2139095040, %v3427_v60 }
 0x45c   :  { %v3434_v3 = vmul.f32 %v2921_v63, %v3419_v44  ;;  %v930_v10 = vpop.f32.mrf.mxu0  ;;  %vm3523_vm1 = vcmp.le.f32.partialorder %v1074_v56, 0.7853982 }
 0x45d   :  { %v2723_v2 = vadd.s32 4294967169, %v1078_v62  ;;  %v975_v61 = vshrl.u32 %v974_v1, 23  ;;  %v978_v4 = vand.u32 8388607, %v971_v0  ;;  %v1082_v6 = vor.u32 8388608, %v1081_v51 }
 0x45e   :  { %v1283_v9 = vand.u32 2139095040, %v3434_v3  ;;  %v3444_v24 = vmul.f32 %v3419_v44, %v930_v10 }
 0x45f   :  { %v1084_v5 = vadd.s32 1, %v2723_v2  ;;  %v2719_v7 = vadd.s32 4294967169, %v975_v61  ;;  %v979_v8 = vor.u32 8388608, %v978_v4  ;;  %v3439_v19 = vshll.u32 %v1082_v6, 8 }
 0x460   :  { %v1284_v14 = vshrl.u32 %v1283_v9, 23 }
 0x461   :  { %vm1085_vm3 = vcmp.gt.s32.totalorder %v1084_v5, 0  ;;  %v981_v13 = vadd.s32 1, %v2719_v7  ;;  %v3441_v21 = vshll.u32 %v979_v8, 8 }
 0x462   :  { %v1086_v12 = vsel %vm1085_vm3, %v1084_v5, 0  ;;  %v2731_v59 = vadd.s32 4294967169, %v1284_v14 }
 0x463   :  { %v1087_v15 = vshrl.u32 %v1086_v12, 5  ;;  %v1088_v18 = vand.u32 31, %v1086_v12  ;;  %vm982_vm4 = vcmp.gt.s32.totalorder %v981_v13, 0 }
 0x464   :  { %v983_v29 = vsel %vm982_vm4, %v981_v13, 0 }
 0x465   :  { %v1089_v25 = vsub.s32 32, %v1088_v18  ;;  %v1091_v22 = vshll.u32 %v3125_v11, %v1088_v18  ;;  %v1094_v27 = vshll.u32 %v3126_v16, %v1088_v18  ;;  %v1097_v30 = vshll.u32 %v3127_v26, %v1088_v18 }
 0x466   :  { %v1100_v33 = vshll.u32 %v3128_v31, %v1088_v18  ;;  %v1103_v20 = vshll.u32 %v3129_v34, %v1088_v18  ;;  %vm1106_vm5 = vcmp.lt.s32.totalorder %v1087_v15, 1  ;;  %vm1107_vm6 = vcmp.lt.s32.totalorder %v1087_v15, 2 }
 0x467   :  { %v1092_v35 = vshrl.u32 %v3126_v16, %v1089_v25  ;;  %v1095_v36 = vshrl.u32 %v3127_v26, %v1089_v25  ;;  %v1098_v37 = vshrl.u32 %v3128_v31, %v1089_v25  ;;  %v1090_v28 = vshrl.u32 %v3125_v11, %v1089_v25 }
 0x468   :  { %v1101_v32 = vshrl.u32 %v3129_v34, %v1089_v25  ;;  %v1104_v23 = vshrl.u32 %v3130_v38, %v1089_v25  ;;  %vm1108_vm7 = vcmp.lt.s32.totalorder %v1087_v15, 3  ;;  %vm1109_vm8 = vcmp.lt.s32.totalorder %v1087_v15, 4 }
 0x469   :  { %v1093_v39 = vor.u32 %v1092_v35, %v1091_v22  ;;  %v1096_v40 = vor.u32 %v1095_v36, %v1094_v27  ;;  %v1099_v17 = vor.u32 %v1098_v37, %v1097_v30  ;;  %v985_v43 = vand.u32 31, %v983_v29 }
 0x46a   :  { %v1102_v41 = vor.u32 %v1101_v32, %v1100_v33  ;;  %v1105_v42 = vor.u32 %v1104_v23, %v1103_v20  ;;  %v984_v51 = vshrl.u32 %v983_v29, 5  ;;  %v1290_v29 = vadd.s32 1, %v2731_v59 }
 0x46b   :  { %v1110_v45 = vsel %vm1106_vm5, %v1090_v28, %v1093_v39  ;;  %v1111_v46 = vsel %vm1109_vm8, %v1099_v17, 2102212464  ;;  %v1114_v48 = vsel %vm1106_vm5, %v1093_v39, %v1096_v40  ;;  %v1118_v49 = vsel %vm1106_vm5, %v1096_v40, %v1099_v17 }
 0x46c   :  { %v1112_v50 = vsel %vm1108_vm7, %v1096_v40, %v1111_v46  ;;  %v1115_v52 = vsel %vm1109_vm8, %v1102_v41, 920167782  ;;  %v1119_v47 = vsel %vm1109_vm8, %v1105_v42, 1326507024  ;;  %v986_v53 = vsub.s32 32, %v985_v43 }
 0x46d   :  { %v1113_v54 = vsel %vm1107_vm6, %v1110_v45, %v1112_v50  ;;  %v1116_v55 = vsel %vm1108_vm7, %v1099_v17, %v1115_v52  ;;  %v1120_v58 = vsel %vm1108_vm7, %v1102_v41, %v1119_v47  ;;  %v988_v1 = vshll.u32 %v3125_v11, %v985_v43 }
 0x46e   :  { %v1117_v62 = vsel %vm1107_vm6, %v1114_v48, %v1116_v55  ;;  %v1121_v63 = vsel %vm1107_vm6, %v1118_v49, %v1120_v58  ;;  %v1129_v6 = vmul.u32 %v3439_v19, %v1113_v54  ;;  %v989_v7 = vshrl.u32 %v3126_v16, %v986_v53 }
 0x46f   :  { %v3469_v2 = vmul.u32.u64.low %v3439_v19, %v1121_v63  ;;  %v3470_v61 = vmul.u32.u64.high %v3439_v19, %v1121_v63, %v3469_v2  ;;  %v3473_v4 = vmul.u32.u64.low %v3439_v19, %v1117_v62  ;;  %v3474_v5 = vmul.u32.u64.high %v3439_v19, %v1117_v62, %v3473_v4 }
 0x470   :  { %v991_v8 = vshll.u32 %v3126_v16, %v985_v43  ;;  %v992_v9 = vshrl.u32 %v3127_v26, %v986_v53  ;;  %v994_v10 = vshll.u32 %v3127_v26, %v985_v43  ;;  %v995_v12 = vshrl.u32 %v3128_v31, %v986_v53 }
 0x471   :  { %v997_v13 = vshll.u32 %v3128_v31, %v985_v43  ;;  %v998_v15 = vshrl.u32 %v3129_v34, %v986_v53  ;;  %v990_v18 = vor.u32 %v989_v7, %v988_v1  ;;  %v1000_v25 = vshll.u32 %v3129_v34, %v985_v43 }
 0x472   :  { %v993_v14 = vor.u32 %v992_v9, %v991_v8  ;;  %v1001_v19 = vshrl.u32 %v3130_v38, %v986_v53  ;;  %vm1131_vm9 = vc.u32 %v3470_v61, %v3473_v4  ;;  %v1132_v22 = vadd.s32 1, %v3474_v5 }
 0x473   :  { %v987_v27 = vshrl.u32 %v3125_v11, %v986_v53  ;;  %v996_v30 = vor.u32 %v995_v12, %v994_v10  ;;  %v999_v33 = vor.u32 %v998_v15, %v997_v13  ;;  %vm1003_vm10 = vcmp.lt.s32.totalorder %v984_v51, 1 }
 0x474   :  { %v1002_v20 = vor.u32 %v1001_v19, %v1000_v25  ;;  %vm1004_vm11 = vcmp.lt.s32.totalorder %v984_v51, 2  ;;  %v1133_v35 = vsel %vm1131_vm9, %v1132_v22, %v3474_v5  ;;  %vm1005_vm12 = vcmp.lt.s32.totalorder %v984_v51, 3 }
 0x475   :  { %vm1006_vm13 = vcmp.lt.s32.totalorder %v984_v51, 4  ;;  %v1011_v36 = vsel %vm1003_vm10, %v990_v18, %v993_v14  ;;  %v1134_v37 = vadd.s32 %v1133_v35, %v1129_v6  ;;  %v1015_v23 = vsel %vm1003_vm10, %v993_v14, %v996_v30 }
 0x476   :  { %v1008_v28 = vsel %vm1006_vm13, %v996_v30, 2102212464  ;;  %v1012_v32 = vsel %vm1006_vm13, %v999_v33, 920167782  ;;  %v1007_v39 = vsel %vm1003_vm10, %v987_v27, %v990_v18  ;;  %v1016_v17 = vsel %vm1006_vm13, %v1002_v20, 1326507024 }
 0x477   :  { %v1013_v40 = vsel %vm1005_vm12, %v996_v30, %v1012_v32  ;;  %v1135_v41 = vadd.s32 536870912, %v1134_v37  ;;  %v1009_v42 = vsel %vm1005_vm12, %v993_v14, %v1008_v28  ;;  %v1017_v45 = vsel %vm1005_vm12, %v999_v33, %v1016_v17 }
 0x478   :  { %v1014_v43 = vsel %vm1004_vm11, %v1011_v36, %v1013_v40  ;;  %v1018_v46 = vsel %vm1004_vm11, %v1015_v23, %v1017_v45  ;;  %v1280_v50 = vand.u32 2147483647, %v3434_v3  ;;  %vm1291_vm14 = vcmp.gt.s32.totalorder %v1290_v29, 0 }
 0x479   :  { %v3495_v48 = vmul.u32.u64.low %v3441_v21, %v1014_v43  ;;  %v3496_v49 = vmul.u32.u64.high %v3441_v21, %v1014_v43, %v3495_v48  ;;  %v1136_v52 = vshrl.u32 %v1135_v41, 30  ;;  %v1010_v54 = vsel %vm1004_vm11, %v1007_v39, %v1009_v42 }
 0x47a   :  { %v3500_v47 = vmul.u32.u64.low %v3441_v21, %v1018_v46  ;;  %v3501_v53 = vmul.u32.u64.high %v3441_v21, %v1018_v46, %v3500_v47  ;;  %v1292_v55 = vsel %vm1291_vm14, %v1290_v29, 0  ;;  %v1287_v62 = vand.u32 8388607, %v1280_v50 }
 0x47b   :  { %v1137_v58 = vshll.u32 %v1136_v52, 30  ;;  %v1029_v59 = vadd.s32 1, %v3496_v49  ;;  %v1180_v63 = vand.u32 2139095040, %v3444_v24  ;;  %v1026_v2 = vmul.u32 %v3441_v21, %v1010_v54 }
 0x47c   :  { %vm1028_vm15 = vc.u32 %v3501_v53, %v3495_v48  ;;  %v1294_v5 = vand.u32 31, %v1292_v55  ;;  %v1288_v8 = vor.u32 8388608, %v1287_v62  ;;  %v1160_v10 = vsub.s32 4, %v1136_v52 }
 0x47d   :  { %v1138_v1 = vsub.s32 %v1134_v37, %v1137_v58  ;;  %v1030_v6 = vsel %vm1028_vm15, %v1029_v59, %v3496_v49  ;;  %v1181_v13 = vshrl.u32 %v1180_v63, 23  ;;  %v1177_v14 = vand.u32 2147483647, %v3444_v24 }
 0x47e   :  { %v1031_v51 = vadd.s32 %v1030_v6, %v1026_v2  ;;  %v1295_v12 = vsub.s32 32, %v1294_v5  ;;  %v1130_v21 = vadd.s32 %v3473_v4, %v3470_v61  ;;  %v3517_v19 = vshrl.u32 %v1292_v55, 5 }
 0x47f   :  { %v1140_v7 = vsub.s32 0, %v1138_v1  ;;  %v3519_v22 = vshll.u32 %v1288_v8, 8  ;;  %v1161_v33 = vsel %vm1076_vm0, %v1160_v10, %v1136_v52  ;;  %v3530_v35 = vadd.s32 4294967169, %v1181_v13 }
 0x480   :  { %v1032_v15 = vadd.s32 536870912, %v1031_v51  ;;  %v1304_v20 = vshrl.u32 %v3128_v31, %v1295_v12  ;;  %v1298_v4 = vshrl.u32 %v3126_v16, %v1295_v12  ;;  %v1301_v36 = vshrl.u32 %v3127_v26, %v1295_v12 }
 0x481   :  { %v2724_v9 = vmin.u32 %v1140_v7, %v1138_v1  ;;  %v1307_v37 = vshrl.u32 %v3129_v34, %v1295_v12  ;;  %v1027_v56 = vadd.s32 %v3495_v48, %v3501_v53  ;;  %v1297_v28 = vshll.u32 %v3125_v11, %v1294_v5 }
 0x482   :  { %v3515_v25 = vshrl.u32 %v1032_v15, 30  ;;  %v1303_v32 = vshll.u32 %v3127_v26, %v1294_v5  ;;  %v1300_v40 = vshll.u32 %v3126_v16, %v1294_v5  ;;  %v1306_v17 = vshll.u32 %v3128_v31, %v1294_v5 }
 0x483   :  { %v1142_v18 = vclz %v2724_v9  ;;  %v1310_v43 = vshrl.u32 %v3130_v38, %v1295_v12  ;;  %v1299_v46 = vor.u32 %v1298_v4, %v1297_v28  ;;  %v1309_v54 = vshll.u32 %v3129_v34, %v1294_v5 }
 0x484   :  { %v1034_v61 = vshll.u32 %v3515_v25, 30  ;;  %v1305_v42 = vor.u32 %v1304_v20, %v1303_v32  ;;  %v1302_v48 = vor.u32 %v1301_v36, %v1300_v40  ;;  %v1308_v49 = vor.u32 %v1307_v37, %v1306_v17 }
 0x485   :  { %v2725_v30 = vadd.s32 4294967294, %v1142_v18  ;;  %v1296_v58 = vshrl.u32 %v3125_v11, %v1295_v12  ;;  %vm1312_vm3 = vcmp.lt.s32.totalorder %v3517_v19, 1  ;;  %vm1315_vm4 = vcmp.lt.s32.totalorder %v3517_v19, 4 }
 0x486   :  { %v3539_v39 = vsub.s32 %v1031_v51, %v1034_v61  ;;  %v1311_v63 = vor.u32 %v1310_v43, %v1309_v54  ;;  %v1317_v2 = vsel %vm1315_vm4, %v1305_v42, 2102212464  ;;  %vm973_vm5 = vcmp.lt.s32.totalorder %v3427_v60, 0 }
 0x487   :  { %vm2726_vm2 = vcmp.lt.s32.totalorder %v2725_v30, 0  ;;  %v1320_v6 = vsel %vm1312_vm3, %v1299_v46, %v1302_v48  ;;  %v1321_v7 = vsel %vm1315_vm4, %v1308_v49, 920167782  ;;  %vm1313_vm6 = vcmp.lt.s32.totalorder %v3517_v19, 2 }
 0x488   :  { %v1145_v23 = vsel %vm2726_vm2, 0, %v2725_v30  ;;  %v1037_v45 = vsub.s32 0, %v3539_v39  ;;  %vm1314_vm7 = vcmp.lt.s32.totalorder %v3517_v19, 3  ;;  %v1316_v8 = vsel %vm1312_vm3, %v1296_v58, %v1299_v46 }
 0x489   :  { %v1146_v29 = vsub.s32 32, %v1145_v23  ;;  %v1150_v41 = vsub.s32 4294967266, %v1145_v23  ;;  %v1147_v52 = vshll.u32 %v1138_v1, %v1145_v23  ;;  %v1163_v1 = vsel %vm3523_vm1, 0, %v1161_v33 }
 0x48a   :  { %v2720_v55 = vmin.u32 %v1037_v45, %v3539_v39  ;;  %v1318_v10 = vsel %vm1314_vm7, %v1302_v48, %v1317_v2  ;;  %v1322_v12 = vsel %vm1314_vm7, %v1305_v42, %v1321_v7  ;;  %v1324_v13 = vsel %vm1312_vm3, %v1302_v48, %v1305_v42 }
 0x48b   :  { %v1148_v47 = vshrl.u32 %v1130_v21, %v1146_v29  ;;  %v1151_v53 = vadd.s32 127, %v1150_v41  ;;  %vm3567_vm8 = vcmp.le.f32.partialorder %v971_v0, 0.7853982  ;;  %v1323_v30 = vsel %vm1313_vm6, %v1320_v6, %v1322_v12 }
 0x48c   :  { %v1039_v5 = vclz %v2720_v55  ;;  %v1325_v33 = vsel %vm1315_vm4, %v1311_v63, 1326507024  ;;  %v3576_v61 = vmul.u32.u64.low %v3519_v22, %v1323_v30  ;;  %v3577_v4 = vmul.u32.u64.high %v3519_v22, %v1323_v30, %v3576_v61 }
 0x48d   :  { %v1149_v59 = vor.u32 %v1148_v47, %v1147_v52  ;;  %v1152_v62 = vshll.u32 %v1151_v53, 23  ;;  %v1326_v20 = vsel %vm1314_vm7, %v1308_v49, %v1325_v33  ;;  %v1057_v0 = vsub.s32 4, %v3515_v25 }
 0x48e   :  { %v2721_v9 = vadd.s32 4294967294, %v1039_v5  ;;  %v1327_v28 = vsel %vm1313_vm6, %v1324_v13, %v1326_v20  ;;  %v1319_v40 = vsel %vm1313_vm6, %v1316_v8, %v1318_v10  ;;  %v1187_v17 = vadd.s32 1, %v3530_v35 }
 0x48f   :  { %v1153_v51 = vor.u32 4788187, %v1152_v62  ;;  %v1156_v18 = vcvt.s32.f32 %v1149_v59  ;;  %v3588_v42 = vmul.u32.u64.low %v3519_v22, %v1327_v28  ;;  %v3589_v43 = vmul.u32.u64.high %v3519_v22, %v1327_v28, %v3588_v42  ;;  %v2924_v62 = vpop.f32.mrf.mxu0 }
 0x490   :  { %vm2722_vm9 = vcmp.lt.s32.totalorder %v2721_v9, 0  ;;  %v1338_v48 = vadd.s32 1, %v3577_v4  ;;  %vm1188_vm10 = vcmp.gt.s32.totalorder %v1187_v17, 0  ;;  %v1058_v19 = vsel %vm973_vm5, %v1057_v0, %v3515_v25 }
 0x491   :  { %v1154_v15 = vand.u32 2147483647, %v1153_v51  ;;  %v1042_v37 = vsel %vm2722_vm9, 0, %v2721_v9  ;;  %v1184_v35 = vand.u32 8388607, %v1177_v14  ;;  %v1335_v54 = vmul.u32 %v3519_v22, %v1319_v40 }
 0x492   :  { %v1043_v32 = vsub.s32 32, %v1042_v37  ;;  %v1047_v23 = vsub.s32 4294967266, %v1042_v37  ;;  %v1044_v41 = vshll.u32 %v3539_v39, %v1042_v37  ;;  %v1189_v39 = vsel %vm1188_vm10, %v1187_v17, 0 }
 0x493   :  { %v1157_v36 = vmul.f32 %v1156_v18, %v1154_v15  ;;  %vm1337_vm11 = vc.u32 %v3589_v43, %v3576_v61  ;;  %v1191_v55 = vand.u32 31, %v1189_v39  ;;  %v1060_v58 = vsel %vm3567_vm8, 0, %v1058_v19 }
 0x494   :  { %v1045_v45 = vshrl.u32 %v1027_v56, %v1043_v32  ;;  %v1048_v46 = vadd.s32 127, %v1047_v23  ;;  %v2008_v56 = vadd.s32 3, %v1163_v1  ;;  %v1339_v59 = vsel %vm1337_vm11, %v1338_v48, %v3577_v4 }
 0x495   :  { %v1158_v29 = vxor.u32 2147483648, %v1157_v36  ;;  %v1340_v27 = vadd.s32 %v1339_v59, %v1335_v54  ;;  %v1192_v63 = vsub.s32 32, %v1191_v55  ;;  %v3608_v2 = vand.u32 3, %v1163_v1 }
 0x496   :  { %v1046_v47 = vor.u32 %v1045_v45, %v1044_v41  ;;  %v1049_v53 = vshll.u32 %v1048_v46, 23  ;;  %v3610_v5 = vand.u32 3, %v2008_v56  ;;  %v1904_v7 = vadd.s32 3, %v1060_v58 }
 0x497   :  { %v1159_v49 = vsel %vm1076_vm0, %v1158_v29, %v1157_v36  ;;  %v1341_v51 = vadd.s32 536870912, %v1340_v27  ;;  %v3613_v8 = vmul.f32 %v2924_v62, %v3419_v44  ;;  %v1185_v10 = vor.u32 8388608, %v1184_v35 }
 0x498   :  { %v1162_v52 = vsel %vm3523_vm1, %v3422_v57, %v1159_v49  ;;  %v1050_v25 = vor.u32 4788187, %v1049_v53  ;;  %v1053_v22 = vcvt.s32.f32 %v1046_v47  ;;  %v1204_v12 = vshrl.u32 %v3129_v34, %v1192_v63 }
 0x499   :  { %3071 = vcosq.f32 %v1162_v52  ;;  %v1207_v13 = vshrl.u32 %v3130_v38, %v1192_v63  ;;  %v3617_v15 = vshrl.u32 %v1341_v51, 30  ;;  %v1195_v1 = vshrl.u32 %v3126_v16, %v1192_v63 }
 0x49a   :  { %3073 = vsinq.f32 %v1162_v52  ;;  %v1051_v6 = vand.u32 2147483647, %v1050_v25  ;;  %v1198_v18 = vshrl.u32 %v3127_v26, %v1192_v63  ;;  %v1203_v30 = vshll.u32 %v3128_v31, %v1191_v55 }
 0x49b   :  { %vm1172_vm12 = vcmp.eq.s32.totalorder %v3608_v2, 2  ;;  %vm2014_vm13 = vcmp.eq.s32.totalorder %v3610_v5, 2  ;;  %v3624_v20 = vshrl.u32 %v1189_v39, 5  ;;  %v1201_v4 = vshrl.u32 %v3128_v31, %v1192_v63 }
 0x49c   :  { %v1054_v9 = vmul.f32 %v1053_v22, %v1051_v6  ;;  %v1206_v36 = vshll.u32 %v3129_v34, %v1191_v55  ;;  %vm1169_vm14 = vcmp.eq.s32.totalorder %v3608_v2, 0  ;;  %vm2011_vm15 = vcmp.eq.s32.totalorder %v3610_v5, 0 }
 0x49d   :  { %v1343_v37 = vshll.u32 %v3617_v15, 30  ;;  %v1194_v0 = vshll.u32 %v3125_v11, %v1191_v55  ;;  %v1197_v28 = vshll.u32 %v3126_v16, %v1191_v55  ;;  %v1205_v32 = vor.u32 %v1204_v12, %v1203_v30 }
 0x49e   :  { %v1055_v33 = vxor.u32 2147483648, %v1054_v9  ;;  %vm1168_vm0 = vcmp.lt.s32.totalorder %v3608_v2, 2  ;;  %vm2010_vm1 = vcmp.lt.s32.totalorder %v3610_v5, 2  ;;  %v3637_v40 = vand.u32 3, %v1060_v58 }
 0x49f   :  { %v1200_v17 = vshll.u32 %v3127_v26, %v1191_v55  ;;  %v1208_v29 = vor.u32 %v1207_v13, %v1206_v36  ;;  %vm1166_vm2 = vweird.f32 %v3422_v57  ;;  %v3644_v42 = vsub.s32 %v1340_v27, %v1343_v37 }
 0x4a0   :  { %v1056_v23 = vsel %vm973_vm5, %v1055_v33, %v1054_v9  ;;  %v1196_v45 = vor.u32 %v1195_v1, %v1194_v0  ;;  %v1199_v46 = vor.u32 %v1198_v18, %v1197_v28  ;;  %v3646_v48 = vand.u32 3, %v1904_v7 }
 0x4a1   :  { %v1059_v41 = vsel %vm3567_vm8, %v3427_v60, %v1056_v23  ;;  %v1202_v49 = vor.u32 %v1201_v4, %v1200_v17  ;;  %vm1212_vm3 = vcmp.lt.s32.totalorder %v3624_v20, 4  ;;  %v1346_v19 = vsub.s32 0, %v3644_v42 }
 0x4a2   :  { %3075 = vcosq.f32 %v1059_v41  ;;  %v1218_v35 = vsel %vm1212_vm3, %v1205_v32, 920167782  ;;  %v3652_v39 = vshll.u32 %v1185_v10, 8  ;;  %vm1282_vm4 = vcmp.lt.s32.totalorder %v3434_v3, 0 }
 0x4a3   :  { %3077 = vsinq.f32 %v1059_v41  ;;  %v1366_v52 = vsub.s32 4, %v3617_v15  ;;  %v1193_v56 = vshrl.u32 %v3125_v11, %v1192_v63  ;;  %vm1209_vm5 = vcmp.lt.s32.totalorder %v3624_v20, 1 }
 0x4a4   :  { %v1222_v47 = vsel %vm1212_vm3, %v1208_v29, 1326507024  ;;  %v2732_v55 = vmin.u32 %v1346_v19, %v3644_v42  ;;  %vm1211_vm6 = vcmp.lt.s32.totalorder %v3624_v20, 3  ;;  %v1217_v25 = vsel %vm1209_vm5, %v1196_v45, %v1199_v46 }
 0x4a5   :  { %v1214_v59 = vsel %vm1212_vm3, %v1202_v49, 2102212464  ;;  %v1219_v62 = vsel %vm1211_vm6, %v1202_v49, %v1218_v35  ;;  %v1221_v27 = vsel %vm1209_vm5, %v1199_v46, %v1202_v49  ;;  %vm3676_vm7 = vcmp.le.f32.partialorder %v1280_v50, 0.7853982 }
 0x4a6   :  { %v3072_v21 = vpop.eup %3071  ;;  %v1348_v7 = vclz %v2732_v55  ;;  %v1223_v51 = vsel %vm1211_vm6, %v1205_v32, %v1222_v47  ;;  %vm1210_vm8 = vcmp.lt.s32.totalorder %v3624_v20, 2  ;;  %v1213_v12 = vsel %vm1209_vm5, %v1193_v56, %v1196_v45 }
 0x4a7   :  { %v3074_v53 = vpop.eup %3073  ;;  %v1173_v54 = vxor.u32 2147483648, %v3072_v21  ;;  %vm1069_vm9 = vcmp.eq.s32.totalorder %v3637_v40, 2  ;;  %v1215_v18 = vsel %vm1211_vm6, %v1199_v46, %v1214_v59  ;;  %vm1066_vm10 = vcmp.eq.s32.totalorder %v3637_v40, 0 }
 0x4a8   :  { %v1170_v58 = vxor.u32 2147483648, %v3074_v53  ;;  %v2733_v1 = vadd.s32 4294967294, %v1348_v7  ;;  %vm1907_vm11 = vcmp.eq.s32.totalorder %v3646_v48, 0  ;;  %v1220_v2 = vsel %vm1210_vm8, %v1217_v25, %v1219_v62 }
 0x4a9   :  { %v1174_v63 = vsel %vm1172_vm12, %v1173_v54, %v3074_v53  ;;  %v2016_v6 = vsel %vm2014_vm13, %v1173_v54, %v3074_v53  ;;  %v1224_v5 = vsel %vm1210_vm8, %v1221_v27, %v1223_v51  ;;  %vm1065_vm12 = vcmp.lt.s32.totalorder %v3637_v40, 2 }
 0x4aa   :  { %v1171_v9 = vsel %vm1169_vm14, %v3072_v21, %v1170_v58  ;;  %v2013_v10 = vsel %vm2011_vm15, %v3072_v21, %v1170_v58  ;;  %vm1906_vm13 = vcmp.lt.s32.totalorder %v3646_v48, 2  ;;  %vm2734_vm14 = vcmp.lt.s32.totalorder %v2733_v1, 0 }
 0x4ab   :  { %v1175_v50 = vsel %vm1168_vm0, %v1171_v9, %v1174_v63  ;;  %v2017_v13 = vsel %vm2010_vm1, %v2013_v10, %v2016_v6  ;;  %v1489_v57 = vand.u32 2139095040, %v3613_v8  ;;  %vm1063_vm15 = vweird.f32 %v3427_v60 }
 0x4ac   :  { %v1176_v30 = vsel %vm1166_vm2, nan, %v1175_v50  ;;  %v2018_v33 = vsel %vm1166_vm2, nan, %v2017_v13  ;;  %v1336_v37 = vadd.s32 %v3576_v61, %v3589_v43  ;;  %v1351_v0 = vsel %vm2734_vm14, 0, %v2733_v1 }
 0x4ad   :  { %v1796_v4 = vmul.f32 0.088388346, %v1176_v30  ;;  %v2644_v36 = vmul.f32 0.088388346, %v2018_v33  ;;  %v3713_v28 = vmul.u32.u64.low %v3652_v39, %v1224_v5  ;;  %v3714_v32 = vmul.u32.u64.high %v3652_v39, %v1224_v5, %v3713_v28 }
 0x4ae   :  { %v1352_v23 = vsub.s32 32, %v1351_v0  ;;  %v1356_v17 = vsub.s32 4294967266, %v1351_v0  ;;  %v1367_v29 = vsel %vm1282_vm4, %v1366_v52, %v3617_v15  ;;  %v1490_v41 = vshrl.u32 %v1489_v57, 23 }
 0x4af   :  { %1804 = vst [vmem:[#allocation3 + $0x10] sm:$0xff] %v1796_v4  ;;  %2652 = vst [vmem:[#allocation3 + $0x18] sm:$0xff] %v2644_v36  ;;  %vm1910_vm0 = vcmp.eq.s32.totalorder %v3646_v48, 2  ;;  %v1216_v45 = vsel %vm1210_vm8, %v1213_v12, %v1215_v18  ;;  %v3723_v61 = vmul.u32.u64.low %v3652_v39, %v1220_v2  ;;  %v3724_v43 = vmul.u32.u64.high %v3652_v39, %v1220_v2, %v3723_v61  ;;  %v3076_v46 = vpop.eup %3075 }
 0x4b0   :  { %v1353_v49 = vshll.u32 %v3644_v42, %v1351_v0  ;;  %v1354_v19 = vshrl.u32 %v1336_v37, %v1352_v23  ;;  %v1357_v35 = vadd.s32 127, %v1356_v17  ;;  %v2739_v21 = vadd.s32 4294967169, %v1490_v41  ;;  %v3078_v56 = vpop.eup %3077 }
 0x4b1   :  { %v1070_v47 = vxor.u32 2147483648, %v3076_v46  ;;  %v1369_v15 = vsel %vm3676_vm7, 0, %v1367_v29  ;;  %vm1234_vm1 = vc.u32 %v3714_v32, %v3723_v61  ;;  %v1486_v20 = vand.u32 2147483647, %v3613_v8 }
 0x4b2   :  { %v1067_v52 = vxor.u32 2147483648, %v3078_v56  ;;  %v1355_v53 = vor.u32 %v1354_v19, %v1353_v49  ;;  %v1358_v54 = vshll.u32 %v1357_v35, 23  ;;  %v1496_v55 = vadd.s32 1, %v2739_v21 }
 0x4b3   :  { %v1071_v42 = vsel %vm1069_vm9, %v1070_v47, %v3078_v56  ;;  %v1912_v25 = vsel %vm1910_vm0, %v1070_v47, %v3078_v56  ;;  %v1232_v58 = vmul.u32 %v3652_v39, %v1216_v45  ;;  %v1235_v59 = vadd.s32 1, %v3724_v43  ;;  %v940_v45 = vpop.f32.mrf.mxu0 }
 0x4b4   :  { %v1068_v62 = vsel %vm1066_vm10, %v3076_v46, %v1067_v52  ;;  %v1909_v27 = vsel %vm1907_vm11, %v3076_v46, %v1067_v52  ;;  %v1359_v63 = vor.u32 4788187, %v1358_v54  ;;  %v1362_v6 = vcvt.s32.f32 %v1355_v53 }
 0x4b5   :  { %v1072_v7 = vsel %vm1065_vm12, %v1068_v62, %v1071_v42  ;;  %v1913_v51 = vsel %vm1906_vm13, %v1909_v27, %v1912_v25  ;;  %v1236_v39 = vsel %vm1234_vm1, %v1235_v59, %v3724_v43  ;;  %vm1497_vm2 = vcmp.gt.s32.totalorder %v1496_v55, 0 }
 0x4b6   :  { %v1073_v9 = vsel %vm1063_vm15, nan, %v1072_v7  ;;  %v1914_v10 = vsel %vm1063_vm15, nan, %v1913_v51  ;;  %v1360_v12 = vand.u32 2147483647, %v1359_v63  ;;  %v1237_v50 = vadd.s32 %v1236_v39, %v1232_v58 }
 0x4b7   :  { %v1795_v13 = vmul.f32 0.088388346, %v1073_v9  ;;  %v2643_v40 = vmul.f32 0.088388346, %v1914_v10  ;;  %v2216_v1 = vadd.s32 3, %v1369_v15  ;;  %v1498_v18 = vsel %vm1497_vm2, %v1496_v55, 0 }
 0x4b8   :  { %v1363_v48 = vmul.f32 %v1362_v6, %v1360_v12  ;;  %v1238_v30 = vadd.s32 536870912, %v1237_v50  ;;  %v1493_v33 = vand.u32 8388607, %v1486_v20  ;;  %v1500_v2 = vand.u32 31, %v1498_v18 }
 0x4b9   :  { %1803 = vst [vmem:[#allocation3] sm:$0xff] %v1795_v13  ;;  %2651 = vst [vmem:[#allocation3 + $0x8] sm:$0xff] %v2643_v40  ;;  %v3759_v60 = vand.u32 3, %v1369_v15  ;;  %v3763_v37 = vand.u32 3, %v2216_v1  ;;  %v1499_v19 = vshrl.u32 %v1498_v18, 5  ;;  %v3781_v15 = vmul.f32 %v3419_v44, %v940_v45 }
 0x4ba   :  { %v1364_v5 = vxor.u32 2147483648, %v1363_v48  ;;  %v3757_v4 = vshrl.u32 %v1238_v30, 30  ;;  %v1501_v36 = vsub.s32 32, %v1500_v2  ;;  %v1494_v28 = vor.u32 8388608, %v1493_v33 }
 0x4bb   :  { %v1509_v46 = vshll.u32 %v3127_v26, %v1500_v2  ;;  %v1503_v35 = vshll.u32 %v3125_v11, %v1500_v2  ;;  %v1506_v22 = vshll.u32 %v3126_v16, %v1500_v2  ;;  %v1512_v47 = vshll.u32 %v3128_v31, %v1500_v2 }
 0x4bc   :  { %v1365_v57 = vsel %vm1282_vm4, %v1364_v5, %v1363_v48  ;;  %v1240_v0 = vshll.u32 %v3757_v4, 30  ;;  %v1504_v17 = vshrl.u32 %v3126_v16, %v1501_v36  ;;  %v1507_v29 = vshrl.u32 %v3127_v26, %v1501_v36 }
 0x4bd   :  { %v1368_v23 = vsel %vm3676_vm7, %v3434_v3, %v1365_v57  ;;  %v1510_v41 = vshrl.u32 %v3128_v31, %v1501_v36  ;;  %v1513_v49 = vshrl.u32 %v3129_v34, %v1501_v36  ;;  %v1515_v54 = vshll.u32 %v3129_v34, %v1500_v2 }
 0x4be   :  { %3079 = vcosq.f32 %v1368_v23  ;;  %v3772_v43 = vsub.s32 %v1237_v50, %v1240_v0  ;;  %v1505_v52 = vor.u32 %v1504_v17, %v1503_v35  ;;  %v1508_v53 = vor.u32 %v1507_v29, %v1506_v22 }
 0x4bf   :  { %3081 = vsinq.f32 %v1368_v23  ;;  %v1511_v56 = vor.u32 %v1510_v41, %v1509_v46  ;;  %v1516_v55 = vshrl.u32 %v3130_v38, %v1501_v36  ;;  %vm1179_vm3 = vcmp.lt.s32.totalorder %v3444_v24, 0 }
 0x4c0   :  { %v1243_v21 = vsub.s32 0, %v3772_v43  ;;  %v1514_v25 = vor.u32 %v1513_v49, %v1512_v47  ;;  %v1233_v58 = vadd.s32 %v3723_v61, %v3714_v32  ;;  %vm1521_vm4 = vcmp.lt.s32.totalorder %v1499_v19, 4 }
 0x4c1   :  { %v1517_v59 = vor.u32 %v1516_v55, %v1515_v54  ;;  %v3789_v62 = vshll.u32 %v1494_v28, 8  ;;  %vm3793_vm5 = vcmp.le.f32.partialorder %v1177_v14, 0.7853982  ;;  %vm1518_vm6 = vcmp.lt.s32.totalorder %v1499_v19, 1 }
 0x4c2   :  { %v2728_v42 = vmin.u32 %v1243_v21, %v3772_v43  ;;  %v1523_v6 = vsel %vm1521_vm4, %v1511_v56, 2102212464  ;;  %v1386_v7 = vand.u32 2139095040, %v3781_v15  ;;  %vm1378_vm7 = vcmp.eq.s32.totalorder %v3759_v60, 2 }
 0x4c3   :  { %vm2222_vm8 = vcmp.eq.s32.totalorder %v3763_v37, 2  ;;  %v1263_v32 = vsub.s32 4, %v3757_v4  ;;  %v1502_v61 = vshrl.u32 %v3125_v11, %v1501_v36  ;;  %vm1519_vm9 = vcmp.lt.s32.totalorder %v1499_v19, 2 }
 0x4c4   :  { %v1245_v63 = vclz %v2728_v42  ;;  %v1526_v14 = vsel %vm1518_vm6, %v1505_v52, %v1508_v53  ;;  %vm1375_vm10 = vcmp.eq.s32.totalorder %v3759_v60, 0  ;;  %vm2219_vm11 = vcmp.eq.s32.totalorder %v3763_v37, 0 }
 0x4c5   :  { %vm1520_vm12 = vcmp.lt.s32.totalorder %v1499_v19, 3  ;;  %v1527_v39 = vsel %vm1521_vm4, %v1514_v25, 920167782  ;;  %v1530_v9 = vsel %vm1518_vm6, %v1508_v53, %v1511_v56  ;;  %vm1374_vm13 = vcmp.lt.s32.totalorder %v3759_v60, 2 }
 0x4c6   :  { %v2729_v51 = vadd.s32 4294967294, %v1245_v63  ;;  %vm2218_vm14 = vcmp.lt.s32.totalorder %v3763_v37, 2  ;;  %v1522_v10 = vsel %vm1518_vm6, %v1502_v61, %v1505_v52  ;;  %v1524_v12 = vsel %vm1520_vm12, %v1508_v53, %v1523_v6 }
 0x4c7   :  { %v1528_v50 = vsel %vm1520_vm12, %v1511_v56, %v1527_v39  ;;  %v1531_v13 = vsel %vm1521_vm4, %v1517_v59, 1326507024  ;;  %vm1372_vm15 = vweird.f32 %v3434_v3  ;;  %v1387_v18 = vshrl.u32 %v1386_v7, 23 }
 0x4c8   :  { %vm2730_vm0 = vcmp.lt.s32.totalorder %v2729_v51, 0  ;;  %v1529_v40 = vsel %vm1519_vm9, %v1526_v14, %v1528_v50  ;;  %v1532_v1 = vsel %vm1520_vm12, %v1514_v25, %v1531_v13  ;;  %v1264_v57 = vsel %vm1179_vm3, %v1263_v32, %v3757_v4 }
 0x4c9   :  { %v1248_v48 = vsel %vm2730_vm0, 0, %v2729_v51  ;;  %v1533_v30 = vsel %vm1519_vm9, %v1530_v9, %v1532_v1  ;;  %v3816_v33 = vmul.u32.u64.low %v3789_v62, %v1529_v40  ;;  %v3817_v2 = vmul.u32.u64.high %v3789_v62, %v1529_v40, %v3816_v33  ;;  %v2927_v9 = vpop.f32.mrf.mxu0 }
 0x4ca   :  { %v1249_v5 = vsub.s32 32, %v1248_v48  ;;  %v1253_v36 = vsub.s32 4294967266, %v1248_v48  ;;  %v2735_v0 = vadd.s32 4294967169, %v1387_v18  ;;  %v1525_v23 = vsel %vm1519_vm9, %v1522_v10, %v1524_v12 }
 0x4cb   :  { %v3080_v28 = vpop.eup %3079  ;;  %v3825_v17 = vmul.u32.u64.low %v3789_v62, %v1533_v30  ;;  %v3826_v29 = vmul.u32.u64.high %v3789_v62, %v1533_v30, %v3825_v17  ;;  %v1383_v41 = vand.u32 2147483647, %v3781_v15  ;;  %v1250_v49 = vshll.u32 %v3772_v43, %v1248_v48 }
 0x4cc   :  { %v3082_v45 = vpop.eup %3081  ;;  %v1379_v46 = vxor.u32 2147483648, %v3080_v28  ;;  %v1251_v35 = vshrl.u32 %v1233_v58, %v1249_v5  ;;  %v1254_v22 = vadd.s32 127, %v1253_v36  ;;  %v1266_v4 = vsel %vm3793_vm5, 0, %v1264_v57 }
 0x4cd   :  { %v1376_v21 = vxor.u32 2147483648, %v3082_v45  ;;  %v1544_v56 = vadd.s32 1, %v3817_v2  ;;  %v1393_v19 = vadd.s32 1, %v2735_v0  ;;  %v1541_v42 = vmul.u32 %v3789_v62, %v1525_v23 }
 0x4ce   :  { %v1380_v47 = vsel %vm1378_vm7, %v1379_v46, %v3082_v45  ;;  %v2224_v52 = vsel %vm2222_vm8, %v1379_v46, %v3082_v45  ;;  %v1252_v53 = vor.u32 %v1251_v35, %v1250_v49  ;;  %v1255_v54 = vshll.u32 %v1254_v22, 23 }
 0x4cf   :  { %v1377_v43 = vsel %vm1375_vm10, %v3080_v28, %v1376_v21  ;;  %v2221_v55 = vsel %vm2219_vm11, %v3080_v28, %v1376_v21  ;;  %vm1543_vm1 = vc.u32 %v3826_v29, %v3816_v33  ;;  %vm1394_vm2 = vcmp.gt.s32.totalorder %v1393_v19, 0 }
 0x4d0   :  { %v1381_v25 = vsel %vm1374_vm13, %v1377_v43, %v1380_v47  ;;  %v2225_v58 = vsel %vm2218_vm14, %v2221_v55, %v2224_v52  ;;  %v1256_v59 = vor.u32 4788187, %v1255_v54  ;;  %v1259_v63 = vcvt.s32.f32 %v1252_v53 }
 0x4d1   :  { %v1382_v6 = vsel %vm1372_vm15, nan, %v1381_v25  ;;  %v2226_v7 = vsel %vm1372_vm15, nan, %v2225_v58  ;;  %v1545_v32 = vsel %vm1543_vm1, %v1544_v56, %v3817_v2  ;;  %v2112_v60 = vadd.s32 3, %v1266_v4 }
 0x4d2   :  { %v1798_v62 = vmul.f32 0.088388346, %v1382_v6  ;;  %v2646_v61 = vmul.f32 0.088388346, %v2226_v7  ;;  %v1257_v14 = vand.u32 2147483647, %v1256_v59  ;;  %v1546_v51 = vadd.s32 %v1545_v32, %v1541_v42 }
 0x4d3   :  { %v1395_v39 = vsel %vm1394_vm2, %v1393_v19, 0  ;;  %v1390_v12 = vand.u32 8388607, %v1383_v41  ;;  %v3858_v1 = vmul.f32 %v2927_v9, %v3419_v44  ;;  %v3860_v18 = vand.u32 3, %v1266_v4 }
 0x4d4   :  { %1806 = vst [vmem:[#allocation3 + $0x30] sm:$0xff] %v1798_v62  ;;  %2654 = vst [vmem:[#allocation3 + $0x38] sm:$0xff] %v2646_v61  ;;  %v1260_v37 = vmul.f32 %v1259_v63, %v1257_v14  ;;  %v1547_v10 = vadd.s32 536870912, %v1546_v51  ;;  %v1397_v50 = vand.u32 31, %v1395_v39  ;;  %v3864_v30 = vand.u32 3, %v2112_v60 }
 0x4d5   :  { %v1391_v5 = vor.u32 8388608, %v1390_v12  ;;  %v1695_v45 = vand.u32 2139095040, %v3858_v1  ;;  %v1396_v22 = vshrl.u32 %v1395_v39, 5  ;;  %vm1275_vm6 = vcmp.eq.s32.totalorder %v3860_v18, 2 }
 0x4d6   :  { %v1261_v3 = vxor.u32 2147483648, %v1260_v37  ;;  %v3855_v13 = vshrl.u32 %v1547_v10, 30  ;;  %v1398_v40 = vsub.s32 32, %v1397_v50  ;;  %v1400_v46 = vshll.u32 %v3125_v11, %v1397_v50 }
 0x4d7   :  { %v1403_v49 = vshll.u32 %v3126_v16, %v1397_v50  ;;  %v1406_v27 = vshll.u32 %v3127_v26, %v1397_v50  ;;  %v1409_v21 = vshll.u32 %v3128_v31, %v1397_v50  ;;  %v1412_v4 = vshll.u32 %v3129_v34, %v1397_v50 }
 0x4d8   :  { %v1262_v48 = vsel %vm1179_vm3, %v1261_v3, %v1260_v37  ;;  %v1549_v2 = vshll.u32 %v3855_v13, 30  ;;  %v1401_v57 = vshrl.u32 %v3126_v16, %v1398_v40  ;;  %v1404_v0 = vshrl.u32 %v3127_v26, %v1398_v40 }
 0x4d9   :  { %v1265_v36 = vsel %vm3793_vm5, %v3444_v24, %v1262_v48  ;;  %v1407_v28 = vshrl.u32 %v3128_v31, %v1398_v40  ;;  %v1410_v17 = vshrl.u32 %v3129_v34, %v1398_v40  ;;  %v1413_v52 = vshrl.u32 %v3130_v38, %v1398_v40 }
 0x4da   :  { %3083 = vcosq.f32 %v1265_v36  ;;  %v3873_v23 = vsub.s32 %v1546_v51, %v1549_v2  ;;  %v1402_v56 = vor.u32 %v1401_v57, %v1400_v46  ;;  %v1405_v19 = vor.u32 %v1404_v0, %v1403_v49 }
 0x4db   :  { %3085 = vsinq.f32 %v1265_v36  ;;  %v1408_v47 = vor.u32 %v1407_v28, %v1406_v27  ;;  %v1411_v54 = vor.u32 %v1410_v17, %v1409_v21  ;;  %v1414_v43 = vor.u32 %v1413_v52, %v1412_v4 }
 0x4dc   :  { %v1552_v35 = vsub.s32 0, %v3873_v23  ;;  %v3885_v55 = vshll.u32 %v1391_v5, 8  ;;  %v1696_v42 = vshrl.u32 %v1695_v45, 23  ;;  %vm1488_vm3 = vcmp.lt.s32.totalorder %v3613_v8, 0 }
 0x4dd   :  { %v1572_v58 = vsub.s32 4, %v3855_v13  ;;  %vm1415_vm4 = vcmp.lt.s32.totalorder %v1396_v22, 1  ;;  %vm1418_vm5 = vcmp.lt.s32.totalorder %v1396_v22, 4  ;;  %vm2118_vm7 = vcmp.eq.s32.totalorder %v3864_v30, 2 }
 0x4de   :  { %v2740_v53 = vmin.u32 %v1552_v35, %v3873_v23  ;;  %v1399_v59 = vshrl.u32 %v3125_v11, %v1398_v40  ;;  %vm1416_vm8 = vcmp.lt.s32.totalorder %v1396_v22, 2  ;;  %v1420_v63 = vsel %vm1418_vm5, %v1408_v47, 2102212464 }
 0x4df   :  { %v1423_v6 = vsel %vm1415_vm4, %v1402_v56, %v1405_v19  ;;  %vm1272_vm9 = vcmp.eq.s32.totalorder %v3860_v18, 0  ;;  %vm2115_vm10 = vcmp.eq.s32.totalorder %v3864_v30, 0  ;;  %vm1417_vm11 = vcmp.lt.s32.totalorder %v1396_v22, 3 }
 0x4e0   :  { %v1554_v25 = vclz %v2740_v53  ;;  %v1424_v32 = vsel %vm1418_vm5, %v1411_v54, 920167782  ;;  %v1427_v62 = vsel %vm1415_vm4, %v1405_v19, %v1408_v47  ;;  %vm1271_vm12 = vcmp.lt.s32.totalorder %v3860_v18, 2 }
 0x4e1   :  { %vm2114_vm13 = vcmp.lt.s32.totalorder %v3864_v30, 2  ;;  %v1419_v61 = vsel %vm1415_vm4, %v1399_v59, %v1402_v56  ;;  %v1425_v14 = vsel %vm1417_vm11, %v1408_v47, %v1424_v32  ;;  %v1428_v51 = vsel %vm1418_vm5, %v1414_v43, 1326507024 }
 0x4e2   :  { %v2741_v7 = vadd.s32 4294967294, %v1554_v25  ;;  %v2747_v60 = vadd.s32 4294967169, %v1696_v42  ;;  %vm1269_vm14 = vweird.f32 %v3444_v24  ;;  %v1421_v39 = vsel %vm1417_vm11, %v1405_v19, %v1420_v63 }
 0x4e3   :  { %v1426_v9 = vsel %vm1416_vm8, %v1423_v6, %v1425_v14  ;;  %v1429_v37 = vsel %vm1417_vm11, %v1411_v54, %v1428_v51  ;;  %v1542_v40 = vadd.s32 %v3816_v33, %v3826_v29  ;;  %v1422_v57 = vsel %vm1416_vm8, %v1419_v61, %v1421_v39 }
 0x4e4   :  { %vm2742_vm15 = vcmp.lt.s32.totalorder %v2741_v7, 0  ;;  %v1430_v12 = vsel %vm1416_vm8, %v1427_v62, %v1429_v37  ;;  %v3906_v50 = vmul.u32.u64.low %v3885_v55, %v1426_v9  ;;  %v3907_v3 = vmul.u32.u64.high %v3885_v55, %v1426_v9, %v3906_v50 }
 0x4e5   :  { %v1557_v10 = vsel %vm2742_vm15, 0, %v2741_v7  ;;  %v1702_v5 = vadd.s32 1, %v2747_v60  ;;  %v3914_v0 = vmul.u32.u64.low %v3885_v55, %v1430_v12  ;;  %v3915_v28 = vmul.u32.u64.high %v3885_v55, %v1430_v12, %v3914_v0 }
 0x4e6   :  { %v1558_v48 = vsub.s32 32, %v1557_v10  ;;  %v1562_v2 = vsub.s32 4294967266, %v1557_v10  ;;  %v1692_v17 = vand.u32 2147483647, %v3858_v1  ;;  %v1559_v49 = vshll.u32 %v3873_v23, %v1557_v10 }
 0x4e7   :  { %v3084_v36 = vpop.eup %3083  ;;  %v1573_v33 = vsel %vm1488_vm3, %v1572_v58, %v3855_v13  ;;  %v1441_v29 = vadd.s32 1, %v3907_v3  ;;  %vm1703_vm0 = vcmp.gt.s32.totalorder %v1702_v5, 0  ;;  %v1438_v52 = vmul.u32 %v3885_v55, %v1422_v57 }
 0x4e8   :  { %v3086_v45 = vpop.eup %3085  ;;  %v1276_v46 = vxor.u32 2147483648, %v3084_v36  ;;  %v1560_v27 = vshrl.u32 %v1542_v40, %v1558_v48  ;;  %v1563_v35 = vadd.s32 127, %v1562_v2  ;;  %vm1440_vm1 = vc.u32 %v3915_v28, %v3906_v50 }
 0x4e9   :  { %v1273_v21 = vxor.u32 2147483648, %v3086_v45  ;;  %v1704_v43 = vsel %vm1703_vm0, %v1702_v5, 0  ;;  %v1442_v55 = vsel %vm1440_vm1, %v1441_v29, %v3907_v3  ;;  %vm3945_vm2 = vcmp.le.f32.partialorder %v1486_v20, 0.7853982 }
 0x4ea   :  { %v1277_v22 = vsel %vm1275_vm6, %v1276_v46, %v3086_v45  ;;  %v2120_v4 = vsel %vm2118_vm7, %v1276_v46, %v3086_v45  ;;  %v1561_v56 = vor.u32 %v1560_v27, %v1559_v49  ;;  %v1564_v19 = vshll.u32 %v1563_v35, 23 }
 0x4eb   :  { %v1274_v23 = vsel %vm1272_vm9, %v3084_v36, %v1273_v21  ;;  %v2117_v47 = vsel %vm2115_vm10, %v3084_v36, %v1273_v21  ;;  %v1443_v7 = vadd.s32 %v1442_v55, %v1438_v52  ;;  %v1706_v18 = vand.u32 31, %v1704_v43  ;;  %v950_v36 = vpop.f32.mrf.mxu0 }
 0x4ec   :  { %v1278_v13 = vsel %vm1271_vm12, %v1274_v23, %v1277_v22  ;;  %v2121_v53 = vsel %vm2114_vm13, %v2117_v47, %v2120_v4  ;;  %v1565_v54 = vor.u32 4788187, %v1564_v19  ;;  %v1568_v58 = vcvt.s32.f32 %v1561_v56 }
 0x4ed   :  { %v1279_v42 = vsel %vm1269_vm14, nan, %v1278_v13  ;;  %v2122_v25 = vsel %vm1269_vm14, nan, %v2121_v53  ;;  %v1444_v62 = vadd.s32 536870912, %v1443_v7  ;;  %v1575_v24 = vsel %vm3945_vm2, 0, %v1573_v33 }
 0x4ee   :  { %v1797_v59 = vmul.f32 0.088388346, %v1279_v42  ;;  %v2645_v63 = vmul.f32 0.088388346, %v2122_v25  ;;  %v1566_v6 = vand.u32 2147483647, %v1565_v54  ;;  %v1709_v9 = vshll.u32 %v3125_v11, %v1706_v18 }
 0x4ef   :  { %v1699_v61 = vand.u32 8388607, %v1692_v17  ;;  %v3953_v14 = vshrl.u32 %v1704_v43, 5  ;;  %v1707_v51 = vsub.s32 32, %v1706_v18  ;;  %v3955_v39 = vshrl.u32 %v1444_v62, 30 }
 0x4f0   :  { %1805 = vst [vmem:[#allocation3 + $0x20] sm:$0xff] %v1797_v59  ;;  %2653 = vst [vmem:[#allocation3 + $0x28] sm:$0xff] %v2645_v63  ;;  %v1569_v32 = vmul.f32 %v1568_v58, %v1566_v6  ;;  %v1712_v20 = vshll.u32 %v3126_v16, %v1706_v18  ;;  %v1715_v12 = vshll.u32 %v3127_v26, %v1706_v18  ;;  %v2424_v0 = vadd.s32 3, %v1575_v24 }
 0x4f1   :  { %v1710_v37 = vshrl.u32 %v3126_v16, %v1707_v51  ;;  %v1713_v10 = vshrl.u32 %v3127_v26, %v1707_v51  ;;  %v1716_v3 = vshrl.u32 %v3128_v31, %v1707_v51  ;;  %v1446_v48 = vshll.u32 %v3955_v39, 30 }
 0x4f2   :  { %v1570_v60 = vxor.u32 2147483648, %v1569_v32  ;;  %v1718_v2 = vshll.u32 %v3128_v31, %v1706_v18  ;;  %v1719_v5 = vshrl.u32 %v3129_v34, %v1707_v51  ;;  %v1721_v21 = vshll.u32 %v3129_v34, %v1706_v18 }
 0x4f3   :  { %v1711_v45 = vor.u32 %v1710_v37, %v1709_v9  ;;  %v1714_v46 = vor.u32 %v1713_v10, %v1712_v20  ;;  %v3971_v49 = vsub.s32 %v1443_v7, %v1446_v48  ;;  %v1717_v27 = vor.u32 %v1716_v3, %v1715_v12 }
 0x4f4   :  { %v1571_v40 = vsel %vm1488_vm3, %v1570_v60, %v1569_v32  ;;  %v1720_v35 = vor.u32 %v1719_v5, %v1718_v2  ;;  %v1722_v33 = vshrl.u32 %v3130_v38, %v1707_v51  ;;  %v3976_v29 = vmul.f32 %v3419_v44, %v950_v36 }
 0x4f5   :  { %v1574_v57 = vsel %vm3945_vm2, %v3613_v8, %v1571_v40  ;;  %v1449_v22 = vsub.s32 0, %v3971_v49  ;;  %v1700_v4 = vor.u32 8388608, %v1699_v61  ;;  %vm1724_vm3 = vcmp.lt.s32.totalorder %v3953_v14, 1 }
 0x4f6   :  { %3087 = vcosq.f32 %v1574_v57  ;;  %vm1727_vm4 = vcmp.lt.s32.totalorder %v3953_v14, 4  ;;  %v3981_v56 = vand.u32 3, %v1575_v24  ;;  %v1723_v19 = vor.u32 %v1722_v33, %v1721_v21 }
 0x4f7   :  { %3089 = vsinq.f32 %v1574_v57  ;;  %v1732_v23 = vsel %vm1724_vm3, %v1711_v45, %v1714_v46  ;;  %v1733_v47 = vsel %vm1727_vm4, %v1720_v35, 920167782  ;;  %v3985_v52 = vand.u32 3, %v2424_v0 }
 0x4f8   :  { %v2736_v13 = vmin.u32 %v1449_v22, %v3971_v49  ;;  %vm1726_vm5 = vcmp.lt.s32.totalorder %v3953_v14, 3  ;;  %v1729_v44 = vsel %vm1727_vm4, %v1717_v27, 2102212464  ;;  %v1708_v53 = vshrl.u32 %v3125_v11, %v1707_v51 }
 0x4f9   :  { %vm1725_vm6 = vcmp.lt.s32.totalorder %v3953_v14, 2  ;;  %v1734_v54 = vsel %vm1726_vm5, %v1717_v27, %v1733_v47  ;;  %v1736_v43 = vsel %vm1724_vm3, %v1714_v46, %v1717_v27  ;;  %v1737_v58 = vsel %vm1727_vm4, %v1723_v19, 1326507024 }
 0x4fa   :  { %v1451_v42 = vclz %v2736_v13  ;;  %v1735_v25 = vsel %vm1725_vm6, %v1732_v23, %v1734_v54  ;;  %v1740_v55 = vshll.u32 %v1700_v4, 8  ;;  %v1728_v59 = vsel %vm1724_vm3, %v1708_v53, %v1711_v45 }
 0x4fb   :  { %v1730_v63 = vsel %vm1726_vm5, %v1714_v46, %v1729_v44  ;;  %v1738_v6 = vsel %vm1726_vm5, %v1720_v35, %v1737_v58  ;;  %vm1580_vm7 = vcmp.lt.s32.totalorder %v3981_v56, 2  ;;  %vm1581_vm8 = vcmp.eq.s32.totalorder %v3981_v56, 0 }
 0x4fc   :  { %v2737_v7 = vadd.s32 4294967294, %v1451_v42  ;;  %v1739_v18 = vsel %vm1725_vm6, %v1736_v43, %v1738_v6  ;;  %v3999_v30 = vmul.u32.u64.low %v1740_v55, %v1735_v25  ;;  %v4000_v32 = vmul.u32.u64.high %v1740_v55, %v1735_v25, %v3999_v30 }
 0x4fd   :  { %v4005_v62 = vmul.u32.u64.low %v1740_v55, %v1739_v18  ;;  %v4006_v24 = vmul.u32.u64.high %v1740_v55, %v1739_v18, %v4005_v62  ;;  %v1592_v61 = vand.u32 2139095040, %v3976_v29  ;;  %vm1578_vm9 = vweird.f32 %v3613_v8 }
 0x4fe   :  { %vm1584_vm10 = vcmp.eq.s32.totalorder %v3981_v56, 2  ;;  %vm2426_vm11 = vcmp.lt.s32.totalorder %v3985_v52, 2  ;;  %vm2738_vm12 = vcmp.lt.s32.totalorder %v2737_v7, 0  ;;  %v1731_v51 = vsel %vm1725_vm6, %v1728_v59, %v1730_v63 }
 0x4ff   :  { %vm2427_vm13 = vcmp.eq.s32.totalorder %v3985_v52, 0  ;;  %vm2430_vm14 = vcmp.eq.s32.totalorder %v3985_v52, 2  ;;  %v1454_v60 = vsel %vm2738_vm12, 0, %v2737_v7  ;;  %v1593_v9 = vshrl.u32 %v1592_v61, 23 }
 0x500   :  { %vm1385_vm15 = vcmp.lt.s32.totalorder %v3781_v15, 0  ;;  %v1439_v20 = vadd.s32 %v3906_v50, %v3915_v28  ;;  %v1455_v37 = vsub.s32 32, %v1454_v60  ;;  %v1459_v10 = vsub.s32 4294967266, %v1454_v60 }
 0x501   :  { %v1750_v12 = vadd.s32 1, %v4000_v32  ;;  %v1456_v40 = vshll.u32 %v3971_v49, %v1454_v60  ;;  %v1747_v14 = vmul.u32 %v1740_v55, %v1731_v51  ;;  %vm1749_vm0 = vc.u32 %v4006_v24, %v3999_v30 }
 0x502   :  { %v2743_v48 = vadd.s32 4294967169, %v1593_v9  ;;  %v1457_v36 = vshrl.u32 %v1439_v20, %v1455_v37  ;;  %v1460_v57 = vadd.s32 127, %v1459_v10  ;;  %v1469_v50 = vsub.s32 4, %v3955_v39 }
 0x503   :  { %v3088_v3 = vpop.eup %3087  ;;  %v1751_v0 = vsel %vm1749_vm0, %v1750_v12, %v4000_v32  ;;  %v1589_v13 = vand.u32 2147483647, %v3976_v29  ;;  %vm1384_vm2 = vcmp.le.f32.partialorder %v1383_v41, 0.7853982  ;;  %vm1694_vm0 = vcmp.lt.s32.totalorder %v3858_v1, 0 }
 0x504   :  { %v3090_v2 = vpop.eup %3089  ;;  %v1585_v5 = vxor.u32 2147483648, %v3088_v3  ;;  %v1752_v28 = vadd.s32 %v1751_v0, %v1747_v14  ;;  %v1599_v46 = vadd.s32 1, %v2743_v48  ;;  %v1458_v35 = vor.u32 %v1457_v36, %v1456_v40 }
 0x505   :  { %v1582_v45 = vxor.u32 2147483648, %v3090_v2  ;;  %v1461_v21 = vshll.u32 %v1460_v57, 23  ;;  %v1470_v52 = vsel %vm1385_vm15, %v1469_v50, %v3955_v39  ;;  %v1596_v6 = vand.u32 8388607, %v1589_v13 }
 0x506   :  { %v1586_v27 = vsel %vm1584_vm10, %v1585_v5, %v3090_v2  ;;  %v2432_v49 = vsel %vm2430_vm14, %v1585_v5, %v3090_v2  ;;  %v1753_v4 = vadd.s32 536870912, %v1752_v28  ;;  %vm1600_vm1 = vcmp.gt.s32.totalorder %v1599_v46, 0 }
 0x507   :  { %v1583_v33 = vsel %vm1581_vm8, %v3088_v3, %v1582_v45  ;;  %v2429_v22 = vsel %vm2427_vm13, %v3088_v3, %v1582_v45  ;;  %v1462_v47 = vor.u32 4788187, %v1461_v21  ;;  %v1601_v43 = vsel %vm1600_vm1, %v1599_v46, 0 }
 0x508   :  { %v1587_v19 = vsel %vm1580_vm7, %v1583_v33, %v1586_v27  ;;  %v2433_v23 = vsel %vm2426_vm11, %v2429_v22, %v2432_v49  ;;  %v4042_v54 = vshrl.u32 %v1753_v4, 30  ;;  %v1465_v56 = vcvt.s32.f32 %v1458_v35 }
 0x509   :  { %v1588_v44 = vsel %vm1578_vm9, nan, %v1587_v19  ;;  %v2434_v53 = vsel %vm1578_vm9, nan, %v2433_v23  ;;  %v1463_v58 = vand.u32 2147483647, %v1462_v47  ;;  %v1603_v59 = vand.u32 31, %v1601_v43 }
 0x50a   :  { %v1800_v42 = vmul.f32 0.088388346, %v1588_v44  ;;  %v2648_v25 = vmul.f32 0.088388346, %v2434_v53  ;;  %v1755_v55 = vshll.u32 %v4042_v54, 30  ;;  %v1472_v32 = vsel %vm1384_vm2, 0, %v1470_v52 }
 0x50b   :  { %v1466_v63 = vmul.f32 %v1465_v56, %v1463_v58  ;;  %v1604_v7 = vsub.s32 32, %v1603_v59  ;;  %v2320_v41 = vadd.s32 3, %v1472_v32  ;;  %v1597_v37 = vor.u32 8388608, %v1596_v6 }
 0x50c   :  { %1808 = vst [vmem:[#allocation3 + $0x50] sm:$0xff] %v1800_v42  ;;  %2656 = vst [vmem:[#allocation3 + $0x58] sm:$0xff] %v2648_v25  ;;  %v1756_v8 = vsub.s32 %v1752_v28, %v1755_v55  ;;  %v1606_v10 = vshll.u32 %v3125_v11, %v1603_v59  ;;  %v1609_v12 = vshll.u32 %v3126_v16, %v1603_v59  ;;  %v4061_v40 = vand.u32 3, %v1472_v32 }
 0x50d   :  { %v1467_v18 = vxor.u32 2147483648, %v1466_v63  ;;  %v1607_v61 = vshrl.u32 %v3126_v16, %v1604_v7  ;;  %v1610_v51 = vshrl.u32 %v3127_v26, %v1604_v7  ;;  %v1613_v60 = vshrl.u32 %v3128_v31, %v1604_v7 }
 0x50e   :  { %v1758_v62 = vsub.s32 0, %v1756_v8  ;;  %v1612_v3 = vshll.u32 %v3127_v26, %v1603_v59  ;;  %v1602_v48 = vshrl.u32 %v1601_v43, 5  ;;  %v1615_v57 = vshll.u32 %v3128_v31, %v1603_v59 }
 0x50f   :  { %v1468_v39 = vsel %vm1385_vm15, %v1467_v18, %v1466_v63  ;;  %v1608_v2 = vor.u32 %v1607_v61, %v1606_v10  ;;  %v1611_v5 = vor.u32 %v1610_v51, %v1609_v12  ;;  %v1616_v45 = vshrl.u32 %v3129_v34, %v1604_v7 }
 0x510   :  { %v1471_v9 = vsel %vm1384_vm2, %v3781_v15, %v1468_v39  ;;  %v2748_v20 = vmin.u32 %v1758_v62, %v1756_v8  ;;  %v1614_v36 = vor.u32 %v1613_v60, %v1612_v3  ;;  %v1618_v50 = vshll.u32 %v3129_v34, %v1603_v59 }
 0x511   :  { %3091 = vcosq.f32 %v1471_v9  ;;  %v1619_v28 = vshrl.u32 %v3130_v38, %v1604_v7  ;;  %v2321_v16 = vand.u32 3, %v2320_v41  ;;  %v1748_v26 = vadd.s32 %v3999_v30, %v4006_v24 }
 0x512   :  { %3093 = vsinq.f32 %v1471_v9  ;;  %v1760_v14 = vclz %v2748_v20  ;;  %v1605_v46 = vshrl.u32 %v3125_v11, %v1604_v7  ;;  %v1637_v27 = vshll.u32 %v1597_v37, 8 }
 0x513   :  { %v1617_v49 = vor.u32 %v1616_v45, %v1615_v57  ;;  %v1620_v35 = vor.u32 %v1619_v28, %v1618_v50  ;;  %vm1624_vm4 = vcmp.lt.s32.totalorder %v1602_v48, 4  ;;  %vm1621_vm5 = vcmp.lt.s32.totalorder %v1602_v48, 1 }
 0x514   :  { %v2749_v0 = vadd.s32 4294967294, %v1760_v14  ;;  %vm1622_vm6 = vcmp.lt.s32.totalorder %v1602_v48, 2  ;;  %v1626_v31 = vsel %vm1624_vm4, %v1614_v36, 2102212464  ;;  %v1629_v34 = vsel %vm1621_vm5, %v1608_v2, %v1611_v5 }
 0x515   :  { %v1633_v4 = vsel %vm1621_vm5, %v1611_v5, %v1614_v36  ;;  %vm1623_vm7 = vcmp.lt.s32.totalorder %v1602_v48, 3  ;;  %v1630_v19 = vsel %vm1624_vm4, %v1617_v49, 920167782  ;;  %v1634_v23 = vsel %vm1624_vm4, %v1620_v35, 1326507024 }
 0x516   :  { %vm2750_vm3 = vcmp.lt.s32.totalorder %v2749_v0, 0  ;;  %v1631_v11 = vsel %vm1623_vm7, %v1614_v36, %v1630_v19  ;;  %v1635_v47 = vsel %vm1623_vm7, %v1617_v49, %v1634_v23  ;;  %v1625_v44 = vsel %vm1621_vm5, %v1605_v46, %v1608_v2 }
 0x517   :  { %v1763_v21 = vsel %vm2750_vm3, 0, %v2749_v0  ;;  %v1627_v53 = vsel %vm1623_vm7, %v1611_v5, %v1626_v31  ;;  %v1632_v43 = vsel %vm1622_vm6, %v1629_v34, %v1631_v11  ;;  %v1636_v42 = vsel %vm1622_vm6, %v1633_v4, %v1635_v47 }
 0x518   :  { %v1764_v33 = vsub.s32 32, %v1763_v21  ;;  %v1768_v22 = vsub.s32 4294967266, %v1763_v21  ;;  %v1765_v38 = vshll.u32 %v1756_v8, %v1763_v21  ;;  %vm1477_vm8 = vcmp.lt.s32.totalorder %v4061_v40, 2 }
 0x519   :  { %v4072_v56 = vmul.u32.u64.low %v1637_v27, %v1636_v42  ;;  %v4073_v52 = vmul.u32.u64.high %v1637_v27, %v1636_v42, %v4072_v56  ;;  %v4075_v55 = vmul.u32.u64.low %v1637_v27, %v1632_v43  ;;  %v4076_v59 = vmul.u32.u64.high %v1637_v27, %v1632_v43, %v4075_v55 }
 0x51a   :  { %v1766_v30 = vshrl.u32 %v1748_v26, %v1764_v33  ;;  %v1769_v24 = vadd.s32 127, %v1768_v22  ;;  %vm1478_vm9 = vcmp.eq.s32.totalorder %v4061_v40, 0  ;;  %vm1481_vm10 = vcmp.eq.s32.totalorder %v4061_v40, 2 }
 0x51b   :  { %vm2322_vm11 = vcmp.lt.s32.totalorder %v2321_v16, 2  ;;  %vm2326_vm12 = vcmp.eq.s32.totalorder %v2321_v16, 2  ;;  %v1628_v18 = vsel %vm1622_vm6, %v1625_v44, %v1627_v53  ;;  %vm1646_vm13 = vc.u32 %v4073_v52, %v4075_v55 }
 0x51c   :  { %v1767_v25 = vor.u32 %v1766_v30, %v1765_v38  ;;  %v1770_v58 = vshll.u32 %v1769_v24, 23  ;;  %vm2323_vm14 = vcmp.eq.s32.totalorder %v2321_v16, 0  ;;  %v1647_v60 = vadd.s32 1, %v4076_v59 }
 0x51d   :  { %v1644_v37 = vmul.u32 %v1637_v27, %v1628_v18  ;;  %vm1475_vm15 = vweird.f32 %v3781_v15  ;;  %v1778_v0 = vsub.s32 4, %v4042_v54  ;;  %vm1693_vm1 = vcmp.le.f32.partialorder %v1692_v17, 0.7853982 }
 0x51e   :  { %v3092_v63 = vpop.eup %3091  ;;  %v1771_v8 = vor.u32 4788187, %v1770_v58  ;;  %v1774_v39 = vcvt.s32.f32 %v1767_v25  ;;  %v1648_v3 = vsel %vm1646_vm13, %v1647_v60, %v4076_v59  ;;  %v1645_v30 = vadd.s32 %v4075_v55, %v4073_v52 }
 0x51f   :  { %v3094_v6 = vpop.eup %3093  ;;  %v1482_v7 = vxor.u32 2147483648, %v3092_v63  ;;  %v1649_v5 = vadd.s32 %v1648_v3, %v1644_v37  ;;  %v1779_v28 = vsel %vm1694_vm0, %v1778_v0, %v4042_v54 }
 0x520   :  { %v1479_v32 = vxor.u32 2147483648, %v3094_v6  ;;  %v1772_v62 = vand.u32 2147483647, %v1771_v8  ;;  %v1781_v26 = vsel %vm1693_vm1, 0, %v1779_v28 }
 0x521   :  { %v1483_v61 = vsel %vm1481_vm10, %v1482_v7, %v3094_v6  ;;  %v2328_v51 = vsel %vm2326_vm12, %v1482_v7, %v3094_v6  ;;  %v1650_v40 = vadd.s32 536870912, %v1649_v5  ;;  %v2632_v49 = vadd.s32 3, %v1781_v26 }
 0x522   :  { %v1480_v9 = vsel %vm1478_vm9, %v3092_v63, %v1479_v32  ;;  %v2325_v41 = vsel %vm2323_vm14, %v3092_v63, %v1479_v32  ;;  %v1775_v20 = vmul.f32 %v1774_v39, %v1772_v62  ;;  %v1785_v21 = vand.u32 3, %v1781_v26 }
 0x523   :  { %v1484_v10 = vsel %vm1477_vm8, %v1480_v9, %v1483_v61  ;;  %v2329_v12 = vsel %vm2322_vm11, %v2325_v41, %v2328_v51  ;;  %v1651_v50 = vshrl.u32 %v1650_v40, 30  ;;  %v2633_v17 = vand.u32 3, %v2632_v49 }
 0x524   :  { %v1485_v14 = vsel %vm1475_vm15, nan, %v1484_v10  ;;  %v2330_v48 = vsel %vm1475_vm15, nan, %v2329_v12  ;;  %v1776_v2 = vxor.u32 2147483648, %v1775_v20  ;;  %vm1786_vm2 = vcmp.lt.s32.totalorder %v1785_v21, 2 }
 0x525   :  { %v1799_v36 = vmul.f32 0.088388346, %v1485_v14  ;;  %v2647_v57 = vmul.f32 0.088388346, %v2330_v48  ;;  %v1652_v16 = vshll.u32 %v1651_v50, 30  ;;  %vm1787_vm3 = vcmp.eq.s32.totalorder %v1785_v21, 0 }
 0x526   :  { %v1777_v15 = vsel %vm1694_vm0, %v1776_v2, %v1775_v20  ;;  %vm1790_vm4 = vcmp.eq.s32.totalorder %v1785_v21, 2  ;;  %vm2635_vm6 = vcmp.eq.s32.totalorder %v2633_v17, 0  ;;  %vm2638_vm7 = vcmp.eq.s32.totalorder %v2633_v17, 2 }
 0x527   :  { %1807 = vst [vmem:[#allocation3 + $0x40] sm:$0xff] %v1799_v36  ;;  %2655 = vst [vmem:[#allocation3 + $0x48] sm:$0xff] %v2647_v57  ;;  %v1780_v45 = vsel %vm1693_vm1, %v3858_v1, %v1777_v15  ;;  %v1653_v46 = vsub.s32 %v1649_v5, %v1652_v16  ;;  %vm2634_vm8 = vcmp.lt.s32.totalorder %v2633_v17, 2  ;;  %vm1784_vm9 = vweird.f32 %v3858_v1 }
 0x528   :  { %3095 = vcosq.f32 %v1780_v45  ;;  %vm1591_vm10 = vcmp.lt.s32.totalorder %v3976_v29, 0  ;;  %v1675_v1 = vsub.s32 4, %v1651_v50  ;;  %vm1590_vm11 = vcmp.le.f32.partialorder %v1589_v13, 0.7853982 }
 0x529   :  { %3097 = vsinq.f32 %v1780_v45  ;;  %v1655_v27 = vsub.s32 0, %v1653_v46 }
 0x52a   :  { %v1676_v51 = vsel %vm1591_vm10, %v1675_v1, %v1651_v50 }
 0x52b   :  { %v2744_v35 = vmin.u32 %v1655_v27, %v1653_v46  ;;  %v1678_v60 = vsel %vm1590_vm11, 0, %v1676_v51 }
 0x52c   :  { %v2528_v9 = vadd.s32 3, %v1678_v60  ;;  %v1682_v41 = vand.u32 3, %v1678_v60 }
 0x52d   :  { %v1657_v31 = vclz %v2744_v35 }
 0x52e   :  { %v2529_v20 = vand.u32 3, %v2528_v9  ;;  %vm1687_vm12 = vcmp.eq.s32.totalorder %v1682_v41, 2  ;;  %vm1684_vm14 = vcmp.eq.s32.totalorder %v1682_v41, 0  ;;  %vm1683_vm0 = vcmp.lt.s32.totalorder %v1682_v41, 2 }
 0x52f   :  { %v2745_v33 = vadd.s32 4294967294, %v1657_v31 }
 0x530   :  { %vm2534_vm13 = vcmp.eq.s32.totalorder %v2529_v20, 2  ;;  %vm2531_vm15 = vcmp.eq.s32.totalorder %v2529_v20, 0  ;;  %vm2530_vm1 = vcmp.lt.s32.totalorder %v2529_v20, 2 }
 0x531   :  { %vm2746_vm5 = vcmp.lt.s32.totalorder %v2745_v33, 0 }
 0x532   :  { %v1660_v54 = vsel %vm2746_vm5, 0, %v2745_v33 }
 0x533   :  { %v1661_v24 = vsub.s32 32, %v1660_v54  ;;  %v1665_v44 = vsub.s32 4294967266, %v1660_v54  ;;  %v1662_v56 = vshll.u32 %v1653_v46, %v1660_v54 }
 0x535   :  { %v3096_v22 = vpop.eup %3095  ;;  %v1663_v42 = vshrl.u32 %v1645_v30, %v1661_v24  ;;  %v1666_v59 = vadd.s32 127, %v1665_v44 }
 0x536   :  { %v3098_v34 = vpop.eup %3097  ;;  %v1791_v4 = vxor.u32 2147483648, %v3096_v22 }
 0x537   :  { %v1788_v38 = vxor.u32 2147483648, %v3098_v34  ;;  %v1664_v6 = vor.u32 %v1663_v42, %v1662_v56  ;;  %v1667_v7 = vshll.u32 %v1666_v59, 23 }
 0x538   :  { %v1792_v19 = vsel %vm1790_vm4, %v1791_v4, %v3098_v34  ;;  %v2640_v23 = vsel %vm2638_vm7, %v1791_v4, %v3098_v34 }
 0x539   :  { %v1789_v11 = vsel %vm1787_vm3, %v3096_v22, %v1788_v38  ;;  %v2637_v47 = vsel %vm2635_vm6, %v3096_v22, %v1788_v38  ;;  %v1668_v52 = vor.u32 4788187, %v1667_v7  ;;  %v1671_v18 = vcvt.s32.f32 %v1664_v6 }
 0x53a   :  { %v1793_v53 = vsel %vm1786_vm2, %v1789_v11, %v1792_v19  ;;  %v2641_v43 = vsel %vm2634_vm8, %v2637_v47, %v2640_v23  ;;  %vm1681_vm2 = vweird.f32 %v3976_v29 }
 0x53b   :  { %v1794_v25 = vsel %vm1784_vm9, nan, %v1793_v53  ;;  %v2642_v58 = vsel %vm1784_vm9, nan, %v2641_v43  ;;  %v1669_v55 = vand.u32 2147483647, %v1668_v52 }
 0x53c   :  { %v1802_v63 = vmul.f32 0.088388346, %v1794_v25  ;;  %v2650_v8 = vmul.f32 0.088388346, %v2642_v58 }
 0x53d   :  { %v1672_v32 = vmul.f32 %v1671_v18, %v1669_v55 }
 0x53e   :  { %1810 = vst [vmem:[#allocation3 + $0x70] sm:$0xff] %v1802_v63  ;;  %2658 = vst [vmem:[#allocation3 + $0x78] sm:$0xff] %v2650_v8 }
 0x53f   :  { %v1673_v62 = vxor.u32 2147483648, %v1672_v32 }
 0x541   :  { %v1674_v39 = vsel %vm1591_vm10, %v1673_v62, %v1672_v32 }
 0x542   :  { %v1677_v61 = vsel %vm1590_vm11, %v3976_v29, %v1674_v39 }
 0x543   :  { %3099 = vcosq.f32 %v1677_v61 }
 0x544   :  { %3101 = vsinq.f32 %v1677_v61 }
 0x550   :  { %v3100_v37 = vpop.eup %3099 }
 0x551   :  { %v3102_v10 = vpop.eup %3101  ;;  %v1688_v12 = vxor.u32 2147483648, %v3100_v37 }
 0x552   :  { %v1685_v3 = vxor.u32 2147483648, %v3102_v10 }
 0x553   :  { %v1689_v14 = vsel %vm1687_vm12, %v1688_v12, %v3102_v10  ;;  %v2536_v13 = vsel %vm2534_vm13, %v1688_v12, %v3102_v10 }
 0x554   :  { %v1686_v48 = vsel %vm1684_vm14, %v3100_v37, %v1685_v3  ;;  %v2533_v2 = vsel %vm2531_vm15, %v3100_v37, %v1685_v3 }
 0x555   :  { %v1690_v5 = vsel %vm1683_vm0, %v1686_v48, %v1689_v14  ;;  %v2537_v36 = vsel %vm2530_vm1, %v2533_v2, %v2536_v13 }
 0x556   :  { %v1691_v57 = vsel %vm1681_vm2, nan, %v1690_v5  ;;  %v2538_v0 = vsel %vm1681_vm2, nan, %v2537_v36 }
 0x557   :  { %v1801_v15 = vmul.f32 0.088388346, %v1691_v57  ;;  %v2649_v40 = vmul.f32 0.088388346, %v2538_v0 }
 0x559   :  { %1809 = vst [vmem:[#allocation3 + $0x60] sm:$0xff] %v1801_v15  ;;  %2657 = vst [vmem:[#allocation3 + $0x68] sm:$0xff] %v2649_v40 }
 0x55a   :  { %3114 = shalt.err (!%p3111_p4)
}
 0x55b   :  { %s3132_s11 = smov 256   ;;  %s3133_s28 = smov 16  }
 0x55c   :  { %2670 = dma.vmem_to_hbm [thread:$0]  %s2665_s3, 2048, %s4123_s12, [#allocation4], %s3132_s11, %s3132_s11, %s3133_s28  }
 0x55d   :  { %3123 = dma.done.wait [#allocation4], 2048  }
 0x55e   :  { %3124 = vsyncadd [#allocation4], 4294965248 }
 0x55f   :  { %2674 = vsyncpa [#allocation4], 1 }

</bundles_post_ra>
